<compile_context>
chip_gen: v7x
topology: tpu7x:2x2x1
jax: 0.10.0
libtpu: 0.0.40
codegen_flags: <defaults>
</compile_context>

<pallas_src>
import jax
import jax.numpy as jnp
from jax import lax
from jax.experimental import pallas as pl
from jax.experimental.pallas import tpu as pltpu


def se_basic_block_kernel(x_ref, wb1_ref, wb2_ref, bn_ref, csf1_ref, f2_ref,
                          rowsum_ref, out_ref, pad_ref):
    # x_ref:      (Nb, H, W*C) f32         current batch tile, W folded into lanes
    # wb*_ref:    (3, W*C, W*C) bf16       block-banded conv weights (one per kernel row)
    # bn_ref:     (4, W*C) f32             rows: s1, b1, s2, b2 (folded BN, tiled over W)
    # csf1_ref:   (W*C, Cr) f32            colsum @ f1  (== tile(f1, (W, 1)))
    # f2_ref:     (Cr, C) f32              SE fc2
    # rowsum_ref: (Nb, Nb*H) f32           per-image row-sum with 1/(H*W) folded in
    # out_ref:    (Nb, H, W*C) f32
    # pad_ref:    (Nb, H+2, W*C) bf16      H-padded activation scratch (reused by both convs)
    Nb, H, WC = x_ref.shape
    NbH = Nb * H
    C = f2_ref.shape[1]
    W = WC // C

    x = x_ref[...]                                             # (Nb, H, WC) f32, kept for residual

    # Zero only the two H-halo rows; interior rows are fully rewritten below.
    # (Re-zero every step: required for correctness under the parallel grid.)
    halo = jnp.zeros((Nb, 1, WC), jnp.bfloat16)
    pad_ref[:, pl.ds(0, 1), :] = halo
    pad_ref[:, pl.ds(H + 1, 1), :] = halo

    def conv3x3(wb_ref):
        # 3x3 / stride 1 / pad 1 conv == 3 matmuls against block-banded weights.
        acc = jnp.zeros((NbH, WC), jnp.float32)
        for kh in range(3):
            slab = pad_ref[:, pl.ds(kh, H), :].reshape(NbH, WC)   # bf16, ready for MXU
            acc = acc + jnp.dot(slab, wb_ref[kh],
                                preferred_element_type=jnp.float32)
        return acc                                             # (NbH, WC) f32

    s1 = bn_ref[pl.ds(0, 1), :]                                # (1, WC) f32
    b1 = bn_ref[pl.ds(1, 1), :]
    s2 = bn_ref[pl.ds(2, 1), :]
    b2 = bn_ref[pl.ds(3, 1), :]

    # --- conv1 + bn1 + relu ---
    pad_ref[:, pl.ds(1, H), :] = x.astype(jnp.bfloat16)
    h = conv3x3(wb1_ref)
    h = jnp.maximum(h * s1 + b1, 0.0)                          # (NbH, WC) f32

    # --- conv2 + bn2 (same padded scratch reused; Cin == Cout) ---
    pad_ref[:, pl.ds(1, H), :] = h.astype(jnp.bfloat16).reshape(Nb, H, WC)
    h2 = conv3x3(wb2_ref)
    h2 = h2 * s2 + b2                                          # (NbH, WC) f32

    # --- Squeeze-Excitation: pool(+1/HW) -> fc1(+over-W sum) -> relu -> fc2 -> sigmoid ---
    y = jnp.dot(rowsum_ref[...], h2, preferred_element_type=jnp.float32)        # (Nb, WC)
    z = jnp.maximum(jnp.dot(y, csf1_ref[...],
                            preferred_element_type=jnp.float32), 0.0)            # (Nb, Cr)
    s = jax.nn.sigmoid(jnp.dot(z, f2_ref[...],
                               preferred_element_type=jnp.float32))              # (Nb, C)
    s_wc = jnp.tile(s, (1, W))                                                    # (Nb, WC), lane tile on VPU

    # Dropout(p=0.5): identity in eval mode.
    # --- scale, residual add, final relu (lane-dense 256-wide store) ---
    h2s = h2.reshape(Nb, H, WC) * s_wc[:, None, :]
    out_ref[...] = jnp.maximum(h2s + x, 0.0)


def _fold_conv_to_banded(w, width):
    """(3,3,Cin,Cout) HWIO -> (3, width*Cin, width*Cout) block-banded (W folded into the matmul)."""
    KH, KW, Cin, Cout = w.shape
    blocks = []
    for kh in range(KH):
        rows = []
        for wi in range(width):
            cols = []
            for wo in range(width):
                kw = wi - wo + 1
                if 0 <= kw < KW:
                    cols.append(w[kh, kw])
                else:
                    cols.append(jnp.zeros((Cin, Cout), w.dtype))
            rows.append(jnp.concatenate(cols, axis=1))
        blocks.append(jnp.concatenate(rows, axis=0))
    return jnp.stack(blocks, axis=0)


def se_basic_block(x_nhwc, params, nb=4):
    """x_nhwc: (N, H, W, C) float32. Returns (N, H, W, C) float32."""
    N, H, W, C = x_nhwc.shape
    KH, KW, Cin, Cout = params["w1"].shape
    # The banded / SE constant construction assumes exactly these conditions.
    assert (KH, KW) == (3, 3) and params["w2"].shape[:2] == (3, 3)
    assert Cin == C and Cout == C, "residual path requires Cin == Cout (downsample=None, stride=1)"
    assert N % nb == 0, "batch must be divisible by the per-step batch tile"
    Cr = params["f1"].shape[-1]
    WC = W * C
    assert WC % 128 == 0, "W*C must be a multiple of 128 for lane-dense tiling"

    # Wrapper-side layout plumbing (free): fold W into the lane axis.
    x_folded = x_nhwc.reshape(N, H, WC)

    wb1 = _fold_conv_to_banded(params["w1"], W).astype(jnp.bfloat16)   # (3, WC, WC)
    wb2 = _fold_conv_to_banded(params["w2"], W).astype(jnp.bfloat16)
    bn = jnp.stack([
        jnp.tile(params["s1"].reshape(C), W),
        jnp.tile(params["b1"].reshape(C), W),
        jnp.tile(params["s2"].reshape(C), W),
        jnp.tile(params["b2"].reshape(C), W),
    ], axis=0).astype(jnp.float32)                                     # (4, WC)
    # SE fc1 pre-multiplied by the over-W column-sum matrix: colsum @ f1 == tile(f1, (W, 1)).
    csf1 = jnp.tile(params["f1"].astype(jnp.float32), (W, 1))          # (WC, Cr)
    f2 = params["f2"].astype(jnp.float32)                              # (Cr, C)
    # Per-image row-sum pooling matrix with 1/(H*W) folded in (SE pool runs on the MXU).
    rowsum = jnp.kron(jnp.eye(nb, dtype=jnp.float32),
                      jnp.full((1, H), 1.0 / float(H * W), jnp.float32))  # (nb, nb*H)

    grid_spec = pltpu.PrefetchScalarGridSpec(
        num_scalar_prefetch=0,
        grid=(N // nb,),
        in_specs=[
            pl.BlockSpec((nb, H, WC), lambda n: (n, 0, 0)),            # x (double-buffered)
            pl.BlockSpec((3, WC, WC), lambda n: (0, 0, 0),
                         pipeline_mode=pl.Buffered(1)),                # wb1 (bf16, constant)
            pl.BlockSpec((3, WC, WC), lambda n: (0, 0, 0),
                         pipeline_mode=pl.Buffered(1)),                # wb2 (bf16, constant)
            pl.BlockSpec((4, WC), lambda n: (0, 0),
                         pipeline_mode=pl.Buffered(1)),                # packed BN scale/shift
            pl.BlockSpec((WC, Cr), lambda n: (0, 0),
                         pipeline_mode=pl.Buffered(1)),                # csf1
            pl.BlockSpec((Cr, C), lambda n: (0, 0),
                         pipeline_mode=pl.Buffered(1)),                # f2
            pl.BlockSpec((nb, nb * H), lambda n: (0, 0),
                         pipeline_mode=pl.Buffered(1)),                # rowsum
        ],
        out_specs=pl.BlockSpec((nb, H, WC), lambda n: (n, 0, 0)),
        scratch_shapes=[
            pltpu.VMEM((nb, H + 2, WC), jnp.bfloat16),                 # shared padded scratch (bf16)
        ],
    )

    out = pl.pallas_call(
        se_basic_block_kernel,
        out_shape=jax.ShapeDtypeStruct((N, H, WC), jnp.float32),
        grid_spec=grid_spec,
        compiler_params=pltpu.CompilerParams(
            dimension_semantics=("parallel",),
            vmem_limit_bytes=32 * 1024 * 1024),
    )(x_folded, wb1, wb2, bn, csf1, f2, rowsum)

    return out.reshape(N, H, W, C)


def make_params(key, planes, reduction=16, eps=1e-5):
    """Deterministic synthetic parameters (HWIO conv weights, folded BN, SE fc)."""
    ks = jax.random.split(key, 10)
    Cr = planes // reduction
    w1 = jax.random.normal(ks[0], (3, 3, planes, planes), jnp.float32) * 0.1
    w2 = jax.random.normal(ks[1], (3, 3, planes, planes), jnp.float32) * 0.1
    # BatchNorm (eval mode): fold (gamma, beta, running_mean, running_var) -> scale/shift
    g1 = 1.0 + 0.1 * jax.random.normal(ks[2], (planes,), jnp.float32)
    be1 = 0.1 * jax.random.normal(ks[3], (planes,), jnp.float32)
    m1 = 0.1 * jax.random.normal(ks[4], (planes,), jnp.float32)
    v1 = jnp.abs(jax.random.normal(ks[5], (planes,), jnp.float32)) + 0.5
    g2 = 1.0 + 0.1 * jax.random.normal(ks[6], (planes,), jnp.float32)
    be2 = 0.1 * jax.random.normal(ks[7], (planes,), jnp.float32)
    m2 = 0.1 * jax.random.normal(ks[8], (planes,), jnp.float32)
    v2 = jnp.abs(jax.random.normal(ks[9], (planes,), jnp.float32)) + 0.5
    s1 = g1 / jnp.sqrt(v1 + eps)
    b1 = be1 - m1 * s1
    s2 = g2 / jnp.sqrt(v2 + eps)
    b2 = be2 - m2 * s2
    # SE fc weights: PyTorch Linear(y) = y @ W.T; store the transposed matrices directly.
    kf1, kf2 = jax.random.split(jax.random.fold_in(key, 123), 2)
    f1 = jax.random.normal(kf1, (planes, Cr), jnp.float32) * 0.2
    f2 = jax.random.normal(kf2, (Cr, planes), jnp.float32) * 0.2
    return {
        "w1": w1, "s1": s1.reshape(1, planes), "b1": b1.reshape(1, planes),
        "w2": w2, "s2": s2.reshape(1, planes), "b2": b2.reshape(1, planes),
        "f1": f1, "f2": f2,
    }


def reference_forward(x_nhwc, params, conv_dtype=jnp.bfloat16):
    """Pure-JAX reference (same math as the PyTorch module in eval mode)."""
    dn = ("NHWC", "HWIO", "NHWC")
    w1 = params["w1"].astype(conv_dtype)
    w2 = params["w2"].astype(conv_dtype)
    h = lax.conv_general_dilated(x_nhwc.astype(conv_dtype), w1, (1, 1), "SAME",
                                 dimension_numbers=dn,
                                 preferred_element_type=jnp.float32)
    h = jnp.maximum(h * params["s1"][0] + params["b1"][0], 0.0)
    h2 = lax.conv_general_dilated(h.astype(conv_dtype), w2, (1, 1), "SAME",
                                  dimension_numbers=dn,
                                  preferred_element_type=jnp.float32)
    h2 = h2 * params["s2"][0] + params["b2"][0]
    y = jnp.mean(h2, axis=(1, 2))                          # (N, C)
    z = jnp.maximum(y @ params["f1"], 0.0)
    s = jax.nn.sigmoid(z @ params["f2"])                   # (N, C)
    h2 = h2 * s[:, None, None, :]
    # dropout: identity (eval mode)
    return jnp.maximum(h2 + x_nhwc, 0.0)


if __name__ == "__main__":
    # planes=32 so planes // reduction(16) >= 1; N=8 with nb=4 -> M=32 rows per matmul
    # and grid=2 (one "parallel" step per v7x TensorCore).
    N, C, H, W = 8, 32, 8, 8
    key = jax.random.PRNGKey(0)
    kx, kp = jax.random.split(key)

    # PyTorch module takes NCHW; generate NCHW then transpose to the kernel's NHWC layout.
    x_nchw = jax.random.normal(kx, (N, C, H, W), jnp.float32)
    x_nhwc = jnp.transpose(x_nchw, (0, 2, 3, 1))

    params = make_params(kp, planes=C, reduction=16)

    out = se_basic_block(x_nhwc, params, nb=4)
    out = jax.block_until_ready(out)
    assert out.shape == (N, H, W, C)

    # Primary check: reference with bf16 conv operands (matches kernel matmul precision).
    ref_bf16 = reference_forward(x_nhwc, params, conv_dtype=jnp.bfloat16)
    err_bf16 = jnp.max(jnp.abs(out - ref_bf16))
    assert jnp.allclose(out, ref_bf16, atol=5e-2, rtol=5e-2), f"bf16-ref max abs err = {err_bf16}"

    # Secondary (loose) check vs. a strict f32 reference so precision regressions aren't hidden.
    ref_f32 = reference_forward(x_nhwc, params, conv_dtype=jnp.float32)
    err_f32 = jnp.max(jnp.abs(out - ref_f32))
    assert jnp.allclose(out, ref_f32, atol=2e-1, rtol=2e-1), f"f32-ref max abs err = {err_f32}"

    print("KERNEL_OK")
</pallas_src>

<mosaic_0001>
module attributes {stable_mosaic.version = 11 : i64} {
  func.func @se_basic_block_kernel(%arg0: i32, %arg1: memref<4x8x256xf32, #tpu.memory_space<vmem>>, %arg2: memref<3x256x256xbf16, #tpu.memory_space<vmem>>, %arg3: memref<3x256x256xbf16, #tpu.memory_space<vmem>>, %arg4: memref<4x256xf32, #tpu.memory_space<vmem>>, %arg5: memref<256x2xf32, #tpu.memory_space<vmem>>, %arg6: memref<2x32xf32, #tpu.memory_space<vmem>>, %arg7: memref<4x32xf32, #tpu.memory_space<vmem>>, %arg8: memref<4x8x256xf32, #tpu.memory_space<vmem>>, %arg9: memref<4x10x256xbf16, #tpu.memory_space<vmem>>) attributes {dimension_semantics = [#tpu.dimension_semantics<parallel>], iteration_bounds = array<i64: 2>, scalar_prefetch = 0 : i64, scratch_operands = 1 : i64, tpu.core_type = #tpu.core_type<tc>, window_params = [{transform_indices = @transform_0, window_bounds = array<i64: 4, 8, 256>}, {pipeline_mode = #tpu.pipeline_mode<synchronous>, transform_indices = @transform_1, window_bounds = array<i64: 3, 256, 256>}, {pipeline_mode = #tpu.pipeline_mode<synchronous>, transform_indices = @transform_2, window_bounds = array<i64: 3, 256, 256>}, {pipeline_mode = #tpu.pipeline_mode<synchronous>, transform_indices = @transform_3, window_bounds = array<i64: 4, 256>}, {pipeline_mode = #tpu.pipeline_mode<synchronous>, transform_indices = @transform_4, window_bounds = array<i64: 256, 2>}, {pipeline_mode = #tpu.pipeline_mode<synchronous>, transform_indices = @transform_5, window_bounds = array<i64: 2, 32>}, {pipeline_mode = #tpu.pipeline_mode<synchronous>, transform_indices = @transform_6, window_bounds = array<i64: 4, 32>}, {transform_indices = @transform_7, window_bounds = array<i64: 4, 8, 256>}]} {
    %c0 = arith.constant 0 : index
    %c0_0 = arith.constant 0 : index
    %c0_1 = arith.constant 0 : index
    %0 = vector.load %arg1[%c0, %c0_0, %c0_1] : memref<4x8x256xf32, #tpu.memory_space<vmem>>, vector<4x8x256xf32>
    %cst = arith.constant 0.000000e+00 : bf16
    %1 = vector.broadcast %cst : bf16 to vector<4x1x256xbf16>
    %c0_2 = arith.constant 0 : index
    %c0_3 = arith.constant 0 : index
    %c0_4 = arith.constant 0 : index
    %2 = vector.load %arg9[%c0_2, %c0_3, %c0_4] : memref<4x10x256xbf16, #tpu.memory_space<vmem>>, vector<4x1x256xbf16>
    tpu.vector_store %arg9[%c0_2, %c0_3, %c0_4], %1 {strides = array<i32>} : memref<4x10x256xbf16, #tpu.memory_space<vmem>>, vector<4x1x256xbf16>,
    %c0_5 = arith.constant 0 : index
    %c9 = arith.constant 9 : index
    %c0_6 = arith.constant 0 : index
    %3 = vector.load %arg9[%c0_5, %c9, %c0_6] : memref<4x10x256xbf16, #tpu.memory_space<vmem>>, vector<4x1x256xbf16>
    tpu.vector_store %arg9[%c0_5, %c9, %c0_6], %1 {strides = array<i32>} : memref<4x10x256xbf16, #tpu.memory_space<vmem>>, vector<4x1x256xbf16>,
    %c0_7 = arith.constant 0 : index
    %c0_8 = arith.constant 0 : index
    %4 = vector.load %arg4[%c0_7, %c0_8] : memref<4x256xf32, #tpu.memory_space<vmem>>, vector<1x256xf32>
    %c1 = arith.constant 1 : index
    %c0_9 = arith.constant 0 : index
    %5 = vector.load %arg4[%c1, %c0_9] : memref<4x256xf32, #tpu.memory_space<vmem>>, vector<1x256xf32>
    %c2 = arith.constant 2 : index
    %c0_10 = arith.constant 0 : index
    %6 = vector.load %arg4[%c2, %c0_10] : memref<4x256xf32, #tpu.memory_space<vmem>>, vector<1x256xf32>
    %c3 = arith.constant 3 : index
    %c0_11 = arith.constant 0 : index
    %7 = vector.load %arg4[%c3, %c0_11] : memref<4x256xf32, #tpu.memory_space<vmem>>, vector<1x256xf32>
    %8 = arith.truncf %0 : vector<4x8x256xf32> to vector<4x8x256xbf16>
    %c0_12 = arith.constant 0 : index
    %c1_13 = arith.constant 1 : index
    %c0_14 = arith.constant 0 : index
    %9 = vector.load %arg9[%c0_12, %c1_13, %c0_14] : memref<4x10x256xbf16, #tpu.memory_space<vmem>>, vector<4x8x256xbf16>
    tpu.vector_store %arg9[%c0_12, %c1_13, %c0_14], %8 {strides = array<i32>} : memref<4x10x256xbf16, #tpu.memory_space<vmem>>, vector<4x8x256xbf16>,
    %cst_15 = arith.constant 0.000000e+00 : f32
    %10 = vector.broadcast %cst_15 : f32 to vector<32x256xf32>
    %c0_16 = arith.constant 0 : index
    %c0_17 = arith.constant 0 : index
    %c0_18 = arith.constant 0 : index
    %11 = vector.load %arg9[%c0_16, %c0_17, %c0_18] : memref<4x10x256xbf16, #tpu.memory_space<vmem>>, vector<4x8x256xbf16>
    %12 = vector.shape_cast %11 : vector<4x8x256xbf16> to vector<32x256xbf16>
    %c0_19 = arith.constant 0 : index
    %c0_20 = arith.constant 0 : index
    %c0_21 = arith.constant 0 : index
    %13 = vector.load %arg2[%c0_19, %c0_20, %c0_21] : memref<3x256x256xbf16, #tpu.memory_space<vmem>>, vector<1x256x256xbf16>
    %14 = vector.shape_cast %13 : vector<1x256x256xbf16> to vector<256x256xbf16>
    %cst_22 = arith.constant dense<0.000000e+00> : vector<32x256xf32>
    %15 = tpu.matmul %12, %14, %cst_22 {dimension_numbers = #tpu.dot_dimension_numbers<[1], [0], [0], [1], [0, 0, 1, 1], [], []>} : vector<32x256xbf16>, vector<256x256xbf16>, vector<32x256xf32> -> vector<32x256xf32>
    %16 = arith.addf %10, %15 : vector<32x256xf32>
    %c0_23 = arith.constant 0 : index
    %c1_24 = arith.constant 1 : index
    %c0_25 = arith.constant 0 : index
    %17 = vector.load %arg9[%c0_23, %c1_24, %c0_25] : memref<4x10x256xbf16, #tpu.memory_space<vmem>>, vector<4x8x256xbf16>
    %18 = vector.shape_cast %17 : vector<4x8x256xbf16> to vector<32x256xbf16>
    %c1_26 = arith.constant 1 : index
    %c0_27 = arith.constant 0 : index
    %c0_28 = arith.constant 0 : index
    %19 = vector.load %arg2[%c1_26, %c0_27, %c0_28] : memref<3x256x256xbf16, #tpu.memory_space<vmem>>, vector<1x256x256xbf16>
    %20 = vector.shape_cast %19 : vector<1x256x256xbf16> to vector<256x256xbf16>
    %cst_29 = arith.constant dense<0.000000e+00> : vector<32x256xf32>
    %21 = tpu.matmul %18, %20, %cst_29 {dimension_numbers = #tpu.dot_dimension_numbers<[1], [0], [0], [1], [0, 0, 1, 1], [], []>} : vector<32x256xbf16>, vector<256x256xbf16>, vector<32x256xf32> -> vector<32x256xf32>
    %22 = arith.addf %16, %21 : vector<32x256xf32>
    %c0_30 = arith.constant 0 : index
    %c2_31 = arith.constant 2 : index
    %c0_32 = arith.constant 0 : index
    %23 = vector.load %arg9[%c0_30, %c2_31, %c0_32] : memref<4x10x256xbf16, #tpu.memory_space<vmem>>, vector<4x8x256xbf16>
    %24 = vector.shape_cast %23 : vector<4x8x256xbf16> to vector<32x256xbf16>
    %c2_33 = arith.constant 2 : index
    %c0_34 = arith.constant 0 : index
    %c0_35 = arith.constant 0 : index
    %25 = vector.load %arg2[%c2_33, %c0_34, %c0_35] : memref<3x256x256xbf16, #tpu.memory_space<vmem>>, vector<1x256x256xbf16>
    %26 = vector.shape_cast %25 : vector<1x256x256xbf16> to vector<256x256xbf16>
    %cst_36 = arith.constant dense<0.000000e+00> : vector<32x256xf32>
    %27 = tpu.matmul %24, %26, %cst_36 {dimension_numbers = #tpu.dot_dimension_numbers<[1], [0], [0], [1], [0, 0, 1, 1], [], []>} : vector<32x256xbf16>, vector<256x256xbf16>, vector<32x256xf32> -> vector<32x256xf32>
    %28 = arith.addf %22, %27 : vector<32x256xf32>
    %29 = vector.broadcast %4 : vector<1x256xf32> to vector<32x256xf32>
    %30 = arith.mulf %28, %29 : vector<32x256xf32>
    %31 = vector.broadcast %5 : vector<1x256xf32> to vector<32x256xf32>
    %32 = arith.addf %30, %31 : vector<32x256xf32>
    %cst_37 = arith.constant 0.000000e+00 : f32
    %33 = vector.broadcast %cst_37 : f32 to vector<32x256xf32>
    %34 = arith.maximumf %32, %33 : vector<32x256xf32>
    %35 = arith.truncf %34 : vector<32x256xf32> to vector<32x256xbf16>
    %36 = vector.shape_cast %35 : vector<32x256xbf16> to vector<4x8x256xbf16>
    %c0_38 = arith.constant 0 : index
    %c1_39 = arith.constant 1 : index
    %c0_40 = arith.constant 0 : index
    %37 = vector.load %arg9[%c0_38, %c1_39, %c0_40] : memref<4x10x256xbf16, #tpu.memory_space<vmem>>, vector<4x8x256xbf16>
    tpu.vector_store %arg9[%c0_38, %c1_39, %c0_40], %36 {strides = array<i32>} : memref<4x10x256xbf16, #tpu.memory_space<vmem>>, vector<4x8x256xbf16>,
    %cst_41 = arith.constant 0.000000e+00 : f32
    %38 = vector.broadcast %cst_41 : f32 to vector<32x256xf32>
    %c0_42 = arith.constant 0 : index
    %c0_43 = arith.constant 0 : index
    %c0_44 = arith.constant 0 : index
    %39 = vector.load %arg9[%c0_42, %c0_43, %c0_44] : memref<4x10x256xbf16, #tpu.memory_space<vmem>>, vector<4x8x256xbf16>
    %40 = vector.shape_cast %39 : vector<4x8x256xbf16> to vector<32x256xbf16>
    %c0_45 = arith.constant 0 : index
    %c0_46 = arith.constant 0 : index
    %c0_47 = arith.constant 0 : index
    %41 = vector.load %arg3[%c0_45, %c0_46, %c0_47] : memref<3x256x256xbf16, #tpu.memory_space<vmem>>, vector<1x256x256xbf16>
    %42 = vector.shape_cast %41 : vector<1x256x256xbf16> to vector<256x256xbf16>
    %cst_48 = arith.constant dense<0.000000e+00> : vector<32x256xf32>
    %43 = tpu.matmul %40, %42, %cst_48 {dimension_numbers = #tpu.dot_dimension_numbers<[1], [0], [0], [1], [0, 0, 1, 1], [], []>} : vector<32x256xbf16>, vector<256x256xbf16>, vector<32x256xf32> -> vector<32x256xf32>
    %44 = arith.addf %38, %43 : vector<32x256xf32>
    %c0_49 = arith.constant 0 : index
    %c1_50 = arith.constant 1 : index
    %c0_51 = arith.constant 0 : index
    %45 = vector.load %arg9[%c0_49, %c1_50, %c0_51] : memref<4x10x256xbf16, #tpu.memory_space<vmem>>, vector<4x8x256xbf16>
    %46 = vector.shape_cast %45 : vector<4x8x256xbf16> to vector<32x256xbf16>
    %c1_52 = arith.constant 1 : index
    %c0_53 = arith.constant 0 : index
    %c0_54 = arith.constant 0 : index
    %47 = vector.load %arg3[%c1_52, %c0_53, %c0_54] : memref<3x256x256xbf16, #tpu.memory_space<vmem>>, vector<1x256x256xbf16>
    %48 = vector.shape_cast %47 : vector<1x256x256xbf16> to vector<256x256xbf16>
    %cst_55 = arith.constant dense<0.000000e+00> : vector<32x256xf32>
    %49 = tpu.matmul %46, %48, %cst_55 {dimension_numbers = #tpu.dot_dimension_numbers<[1], [0], [0], [1], [0, 0, 1, 1], [], []>} : vector<32x256xbf16>, vector<256x256xbf16>, vector<32x256xf32> -> vector<32x256xf32>
    %50 = arith.addf %44, %49 : vector<32x256xf32>
    %c0_56 = arith.constant 0 : index
    %c2_57 = arith.constant 2 : index
    %c0_58 = arith.constant 0 : index
    %51 = vector.load %arg9[%c0_56, %c2_57, %c0_58] : memref<4x10x256xbf16, #tpu.memory_space<vmem>>, vector<4x8x256xbf16>
    %52 = vector.shape_cast %51 : vector<4x8x256xbf16> to vector<32x256xbf16>
    %c2_59 = arith.constant 2 : index
    %c0_60 = arith.constant 0 : index
    %c0_61 = arith.constant 0 : index
    %53 = vector.load %arg3[%c2_59, %c0_60, %c0_61] : memref<3x256x256xbf16, #tpu.memory_space<vmem>>, vector<1x256x256xbf16>
    %54 = vector.shape_cast %53 : vector<1x256x256xbf16> to vector<256x256xbf16>
    %cst_62 = arith.constant dense<0.000000e+00> : vector<32x256xf32>
    %55 = tpu.matmul %52, %54, %cst_62 {dimension_numbers = #tpu.dot_dimension_numbers<[1], [0], [0], [1], [0, 0, 1, 1], [], []>} : vector<32x256xbf16>, vector<256x256xbf16>, vector<32x256xf32> -> vector<32x256xf32>
    %56 = arith.addf %50, %55 : vector<32x256xf32>
    %57 = vector.broadcast %6 : vector<1x256xf32> to vector<32x256xf32>
    %58 = arith.mulf %56, %57 : vector<32x256xf32>
    %59 = vector.broadcast %7 : vector<1x256xf32> to vector<32x256xf32>
    %60 = arith.addf %58, %59 : vector<32x256xf32>
    %c0_63 = arith.constant 0 : index
    %c0_64 = arith.constant 0 : index
    %61 = vector.load %arg7[%c0_63, %c0_64] : memref<4x32xf32, #tpu.memory_space<vmem>>, vector<4x32xf32>
    %cst_65 = arith.constant dense<0.000000e+00> : vector<4x256xf32>
    %62 = tpu.matmul %61, %60, %cst_65 {dimension_numbers = #tpu.dot_dimension_numbers<[1], [0], [0], [1], [0, 0, 1, 1], [], []>} : vector<4x32xf32>, vector<32x256xf32>, vector<4x256xf32> -> vector<4x256xf32>
    %c0_66 = arith.constant 0 : index
    %c0_67 = arith.constant 0 : index
    %63 = vector.load %arg5[%c0_66, %c0_67] : memref<256x2xf32, #tpu.memory_space<vmem>>, vector<256x2xf32>
    %cst_68 = arith.constant dense<0.000000e+00> : vector<4x2xf32>
    %64 = tpu.matmul %62, %63, %cst_68 {dimension_numbers = #tpu.dot_dimension_numbers<[1], [0], [0], [1], [0, 0, 1, 1], [], []>} : vector<4x256xf32>, vector<256x2xf32>, vector<4x2xf32> -> vector<4x2xf32>
    %cst_69 = arith.constant 0.000000e+00 : f32
    %65 = vector.broadcast %cst_69 : f32 to vector<4x2xf32>
    %66 = arith.maximumf %64, %65 : vector<4x2xf32>
    %c0_70 = arith.constant 0 : index
    %c0_71 = arith.constant 0 : index
    %67 = vector.load %arg6[%c0_70, %c0_71] : memref<2x32xf32, #tpu.memory_space<vmem>>, vector<2x32xf32>
    %cst_72 = arith.constant dense<0.000000e+00> : vector<4x32xf32>
    %68 = tpu.matmul %66, %67, %cst_72 {dimension_numbers = #tpu.dot_dimension_numbers<[1], [0], [0], [1], [0, 0, 1, 1], [], []>} : vector<4x2xf32>, vector<2x32xf32>, vector<4x32xf32> -> vector<4x32xf32>
    %69 = arith.negf %68 : vector<4x32xf32>
    %70 = math.exp %69 : vector<4x32xf32>
    %cst_73 = arith.constant 1.000000e+00 : f32
    %71 = vector.broadcast %cst_73 : f32 to vector<4x32xf32>
    %72 = arith.addf %71, %70 : vector<4x32xf32>
    %73 = arith.divf %71, %72 : vector<4x32xf32>
    %74 = tpu.concatenate %73, %73, %73, %73, %73, %73, %73, %73 in 1 : vector<4x32xf32>, vector<4x32xf32>, vector<4x32xf32>, vector<4x32xf32>, vector<4x32xf32>, vector<4x32xf32>, vector<4x32xf32>, vector<4x32xf32> -> vector<4x256xf32>
    %75 = vector.shape_cast %60 : vector<32x256xf32> to vector<4x8x256xf32>
    %76 = vector.shape_cast %74 : vector<4x256xf32> to vector<4x1x256xf32>
    %77 = vector.broadcast %76 : vector<4x1x256xf32> to vector<4x8x256xf32>
    %78 = arith.mulf %75, %77 : vector<4x8x256xf32>
    %79 = arith.addf %78, %0 : vector<4x8x256xf32>
    %cst_74 = arith.constant 0.000000e+00 : f32
    %80 = vector.broadcast %cst_74 : f32 to vector<4x8x256xf32>
    %81 = arith.maximumf %79, %80 : vector<4x8x256xf32>
    %c0_75 = arith.constant 0 : index
    %c0_76 = arith.constant 0 : index
    %c0_77 = arith.constant 0 : index
    %82 = vector.load %arg8[%c0_75, %c0_76, %c0_77] : memref<4x8x256xf32, #tpu.memory_space<vmem>>, vector<4x8x256xf32>
    tpu.vector_store %arg8[%c0_75, %c0_76, %c0_77], %81 {strides = array<i32>} : memref<4x8x256xf32, #tpu.memory_space<vmem>>, vector<4x8x256xf32>,
    return
  }
  func.func @transform_0(%arg0: i32) -> (i32, i32, i32) {
    %c0_i32 = arith.constant 0 : i32
    %c0_i32_0 = arith.constant 0 : i32
    %c0_i32_1 = arith.constant 0 : i32
    return %arg0, %c0_i32, %c0_i32_0 : i32, i32, i32
  }
  func.func @transform_1(%arg0: i32) -> (i32, i32, i32) {
    %c0_i32 = arith.constant 0 : i32
    %c0_i32_0 = arith.constant 0 : i32
    %c0_i32_1 = arith.constant 0 : i32
    %c0_i32_2 = arith.constant 0 : i32
    return %c0_i32, %c0_i32_0, %c0_i32_1 : i32, i32, i32
  }
  func.func @transform_2(%arg0: i32) -> (i32, i32, i32) {
    %c0_i32 = arith.constant 0 : i32
    %c0_i32_0 = arith.constant 0 : i32
    %c0_i32_1 = arith.constant 0 : i32
    %c0_i32_2 = arith.constant 0 : i32
    return %c0_i32, %c0_i32_0, %c0_i32_1 : i32, i32, i32
  }
  func.func @transform_3(%arg0: i32) -> (i32, i32) {
    %c0_i32 = arith.constant 0 : i32
    %c0_i32_0 = arith.constant 0 : i32
    %c0_i32_1 = arith.constant 0 : i32
    return %c0_i32, %c0_i32_0 : i32, i32
  }
  func.func @transform_4(%arg0: i32) -> (i32, i32) {
    %c0_i32 = arith.constant 0 : i32
    %c0_i32_0 = arith.constant 0 : i32
    %c0_i32_1 = arith.constant 0 : i32
    return %c0_i32, %c0_i32_0 : i32, i32
  }
  func.func @transform_5(%arg0: i32) -> (i32, i32) {
    %c0_i32 = arith.constant 0 : i32
    %c0_i32_0 = arith.constant 0 : i32
    %c0_i32_1 = arith.constant 0 : i32
    return %c0_i32, %c0_i32_0 : i32, i32
  }
  func.func @transform_6(%arg0: i32) -> (i32, i32) {
    %c0_i32 = arith.constant 0 : i32
    %c0_i32_0 = arith.constant 0 : i32
    %c0_i32_1 = arith.constant 0 : i32
    return %c0_i32, %c0_i32_0 : i32, i32
  }
  func.func @transform_7(%arg0: i32) -> (i32, i32, i32) {
    %c0_i32 = arith.constant 0 : i32
    %c0_i32_0 = arith.constant 0 : i32
    %c0_i32_1 = arith.constant 0 : i32
    return %arg0, %c0_i32, %c0_i32_0 : i32, i32, i32
  }
}

</mosaic_0001>

<bundles_post_ra>
// kernel: tpu_custom_call.1
= control target key start
LH: loop header
LB: loop body
LE: loop exit
PB: predicated region body
PF: predicated region fallthrough
CT: control target
= control target key end

     0   :  { %12 = vsyncpa [#allocation4], 0  ;;  %s4434_s0 = inlined_call_operand.vmem [shape: f32[8,8,256], index: 0, kind: input, shape index: {}]   ;;  %s4435_s1 = inlined_call_operand.hbm [shape: bf16[3,256,256], index: 1, kind: input, shape index: {}]   ;;  %s4436_s2 = inlined_call_operand.hbm [shape: bf16[3,256,256], index: 2, kind: input, shape index: {}]   ;;  %s4437_s3 = inlined_call_operand.vmem [shape: f32[4,256], index: 3, kind: input, shape index: {}]   ;;  %s4438_s4 = inlined_call_operand.vmem [shape: f32[256,2], index: 4, kind: input, shape index: {}]   ;;  %s4439_s5 = inlined_call_operand.vmem [shape: f32[2,32], index: 5, kind: input, shape index: {}]   ;;  %s4440_s6 = inlined_call_operand.vmem [shape: f32[4,32], index: 6, kind: input, shape index: {}]   ;;  %s4441_s7 = inlined_call_operand.hbm [shape: f32[8,8,256], index: 7, kind: output, shape index: {}]  }
   0x1   :  { %13 = vsyncpa [#allocation7], 0 }
   0x2   :  { %14 = vsyncpa [#allocation5], 0 }
   0x3   :  { %16 = vsyncpa [#allocation5 + $0x1], 0  ;;  %s3824_s24 = smov 0   ;;  %s3826_s25 = smov 0  }
   0x4   :  { %s3828_s26 = smov 0   ;;  %s3830_s27 = smov 0  }
   0x5 LB: > { %s3845_s28 = sadd.s32 4294967295, %s3769_s27   ;;  %s2889_s29 = sadd.s32 4294967294, %s3769_s27   ;;  %s3769_s27 = sphi %s3830_s27, %s4471_s27   ;;  %s3765_s26 = sphi %s3828_s26, %s4470_s26   ;;  %s3761_s25 = sphi %s3826_s25, %s4469_s25   ;;  %s3757_s24 = sphi %s3824_s24, %s4468_s24  }
   0x6   : > { %s3849_s30 = sadd.s32 1, %s3769_s27   ;;  %s181_s8 = sadd.s32 1, %s3765_s26 }
   0x7   : > { %s178_s9 = ssub.s32 %s3769_s27, %s3849_s30  ;;  %p191_p0 = scmp.ne.s32.totalorder %s3765_s26, %s3761_s25 }
   0x8   : > { %p179_p1 = scmp.eq.s32.totalorder %s178_s9, 0  ;;  %p192_p2 = scmp.eq.s32.totalorder %s3845_s28, 1 }
   0x9   : > { %p197_p3 = scmp.ne.s32.totalorder %s3761_s25, %s3757_s24  ;;  %p198_p4 = scmp.eq.s32.totalorder %s2889_s29, 1 }
   0xa   : > { %s3860_s10 = scalar_select %p179_p1, %s3765_s26, %s181_s8  }
   0xb   : > { %p3862_p5 = por %p192_p2, %p191_p0  ;;  %p3866_p6 = por %p198_p4, %p197_p3 }
   0xc   : > { %4445 = sst [smem:[#allocation12_spill]] %s3860_s10  ;;  %p2890_p7 = scmp.ge.s32.totalorder %s3769_s27, 1 }
   0xd   : > { %s4446_s11 = scalar_select %p3862_p5, 1, 0 }
   0xe   : > { %s4447_s12 = scalar_select %p3866_p6, 1, 0 }
   0xf   : > { %p205_p8 = scmp.lt.s32.totalorder %s3769_s27, 3  ;;  %p4442_p9 = scmp.eq.s32.totalorder %s3845_s28, 0 }
  0x10   : > { %s3771_s14 = smov [#allocation3]   ;;  %s3772_s17 = smov [#allocation6]  }
  0x11   : > { %p3873_p10 = pnand %p2890_p7, %p205_p8  ;;  %s217_s15 = sshll.u32 %s3771_s14, 4  ;;  %s218_s15 = int_to_ptr.vmem [resolvable:$true] %s217_s15 }
  0x12   : > { %s230_s18 = sshll.u32 %s3772_s17, 4  ;;  %s3643_s21 = scalar_lea.hbm %s4435_s1, 12288  ;;  %s3885_s18 = int_to_ptr.vmem [resolvable:$true] %s230_s18 }
  0x13   : > { %s4448_s13 = scalar_select %p3873_p10, 1, 0 }
  0x14   : > { %p3281_p11 = pneg %p3873_p10  ;;  %p3644_p13 = scmp.ne.s32.totalorder %s4435_s1, %s3643_s21 }
  0x15   : > { %p3650_p3 = scmp.lt.u32.totalorder %s3643_s21, %s4435_s1 }
  0x16   : > { %p3881_p12 = pnand %p4442_p9, %p3281_p11 }
  0x18   : > { %p3645_p0 = pneg %p3881_p12 }
  0x1a   : > { %p3646_p1 = pnand %p3645_p0, %p3644_p13 }
  0x1c   : > { %p3647_p2 = pneg %p3646_p1 }
  0x1e   : > { %p3652_p4 = pnand %p3650_p3, %p3647_p2 }
  0x20   : > { %3655 = shalt.err (!%p3652_p4)
}
  0x21   : > { %s3656_s9 = scalar_lea.vmem %s218_s15, 12288  ;;  %p3664_p9 = scmp.lt.s32.totalorder %s218_s15, %s218_s15 }
  0x22   : > { %p3657_p7 = scmp.ne.s32.totalorder %s218_s15, %s3656_s9  ;;  %p3665_p6 = scmp.lt.s32.totalorder %s3656_s9, %s3656_s9 }
  0x24   : > { %p3659_p8 = pnand %p3657_p7, %p3645_p0  ;;  %p3666_p5 = por %p3665_p6, %p3664_p9 }
  0x26   : > { %p3660_p11 = pneg %p3659_p8 }
  0x28   : > { %p3667_p10 = pnand %p3666_p5, %p3660_p11 }
  0x2a   : > { %3670 = shalt.err (!%p3667_p10)
}
  0x2b   : > { %s3773_s14 = smov 128   ;;  %s3774_s17 = smov 8  }
  0x2c   : > { %3284 = dma.hbm_to_vmem [thread:$0]  (!%p3881_p12), %s4435_s1, 12288, %s218_s15, [#allocation4], %s3773_s14, %s3773_s14, %s3774_s17  }
  0x2d   : > { %s3671_s23 = scalar_lea.hbm %s4436_s2, 12288 }
  0x2e   : > { %p3672_p13 = scmp.ne.s32.totalorder %s4436_s2, %s3671_s23  ;;  %p3678_p9 = scmp.lt.u32.totalorder %s3671_s23, %s4436_s2 }
  0x30   : > { %p3674_p5 = pnand %p3672_p13, %p3645_p0 }
  0x32   : > { %p3675_p6 = pneg %p3674_p5 }
  0x34   : > { %p3680_p10 = pnand %p3678_p9, %p3675_p6 }
  0x36   : > { %3683 = shalt.err (!%p3680_p10)
}
  0x37   : > { %s3684_s15 = scalar_lea.vmem %s3885_s18, 12288  ;;  %p3692_p4 = scmp.lt.s32.totalorder %s3885_s18, %s3885_s18 }
  0x38   : > { %p3685_p1 = scmp.ne.s32.totalorder %s3885_s18, %s3684_s15  ;;  %p3693_p7 = scmp.lt.s32.totalorder %s3684_s15, %s3684_s15 }
  0x3a   : > { %p3687_p2 = pnand %p3685_p1, %p3645_p0  ;;  %p3694_p8 = por %p3693_p7, %p3692_p4 }
  0x3c   : > { %p3688_p3 = pneg %p3687_p2 }
  0x3e   : > { %p3695_p11 = pnand %p3694_p8, %p3688_p3 }
  0x40   : > { %3698 = shalt.err (!%p3695_p11)
}
  0x41   : > { %3287 = dma.hbm_to_vmem [thread:$0]  (!%p3881_p12), %s4436_s2, 12288, %s3885_s18, [#allocation7], %s3773_s14, %s3773_s14, %s3774_s17  }
  0x42   : > { %p4450_p13 = scmp.ne.s32.totalorder %s4448_s13, 0 }
  0x43   : > { %p4451_p5 = scmp.eq.s32.totalorder (!%p4450_p13), %s3845_s28, 0 }
  0x44   : > { %268 = sbr.rel (%p4450_p13) target bundleno = 1705 (0x6a9), region = 48 }
  0x4b   : > { %3744 = dma.done.wait (%p4451_p5), [#allocation4], 12288   ;;  %p4452_p0 = pmov %p4451_p5 }
  0x4d   : > { %3746 = vsyncadd (%p4452_p0), [#allocation4], 4294955008  ;;  %p4453_p6 = pmov %p4452_p0 }
  0x4e   : > { %p4454_p9 = pmov %p4452_p0 }
  0x4f   : > { %3748 = dma.done.wait (%p4453_p6), [#allocation7], 12288  }
  0x50   : > { %3750 = vsyncadd (%p4454_p9), [#allocation7], 4294955008  ;;  %v3341_v0 = vld [vmem:[#allocation3 + $0x104] ss:$8 sps:$4 sm:$0xff]   ;;  %v3343_v1 = vld [vmem:[#allocation3 + $0x100] ss:$8 sps:$4 sm:$0xff]  }
  0x51   : > { %770 = vmatprep.subr.bf16.mxu0 %v3341_v0  ;;  %v3344_v2 = vld [vmem:[#allocation3 + $0x114] ss:$8 sps:$4 sm:$0xff]   ;;  %v3346_v3 = vld [vmem:[#allocation3 + $0x110] ss:$8 sps:$4 sm:$0xff]   ;;  %v3347_v4 = vld [vmem:[#allocation3 + $0x124] ss:$8 sps:$4 sm:$0xff]  }
  0x52   : > { %771 = vmatpush1.bf16.msra.mxu0 %v3343_v1  ;;  %s2898_s13 = sshll.u32 %s3845_s28, 2  ;;  %v3349_v5 = vld [vmem:[#allocation3 + $0x120] ss:$8 sps:$4 sm:$0xff]   ;;  %v3350_v6 = vld [vmem:[#allocation3 + $0x134] ss:$8 sps:$4 sm:$0xff]   ;;  %vm322_vm1 = vcmask 1040384  }
  0x53   : > { %772 = vmatprep.subr.bf16.mxu0 %v3344_v2  ;;  %p306_p12 = scmp.lt.s32.totalorder %s2898_s13, 7  ;;  %vm323_vm0 = vsmask.f32 256  ;;  %vm325_vm2 = vcmask 1044484   ;;  %vm326_vm3 = vsmask.f32 4352 }
  0x54   : > { %v3352_v7 = vld [vmem:[#allocation3 + $0x130] ss:$8 sps:$4 sm:$0xff]   ;;  %vm324_vm4 = vmand %vm322_vm1, %vm323_vm0  ;;  %vm341_vm5 = vsmask.f32 7938  ;;  %v3353_v8 = vld [vmem:[#allocation3 + $0x144] ss:$8 sps:$4 sm:$0xff]  }
  0x55   : > { %s4473_s13 = smov (!%p306_p12, %s2898_s13), 7  ;;  %vm343_vm6 = vsmask.f32 7954  ;;  %vm327_vm7 = vmand %vm325_vm2, %vm326_vm3  ;;  %v3355_v9 = vld [vmem:[#allocation3 + $0x140] ss:$8 sps:$4 sm:$0xff]   ;;  %vm433_vm12 = vcmask 1043456  }
  0x56   : > { %773 = vmatpush1.bf16.msra.mxu0 %v3346_v3  ;;  %vm342_vm8 = vmand %vm322_vm1, %vm341_vm5  ;;  %s3146_s16 = sshll.u32 %s4473_s13, 4  ;;  %v3356_v10 = vld [vmem:[#allocation3 + $0x154] ss:$8 sps:$4 sm:$0xff]   ;;  %v3358_v12 = vld [vmem:[#allocation3 + $0x150] ss:$8 sps:$4 sm:$0xff]   ;;  %vm435_vm13 = vcmask 1047556  }
  0x57   : > { %774 = vmatprep.subr.bf16.mxu0 %v3347_v4  ;;  %vm344_vm9 = vmand %vm325_vm2, %vm343_vm6  ;;  %s3952_s17 = scalar_lea.vmem %s4434_s0, %s3146_s16  ;;  %v3359_v14 = vld [vmem:[#allocation3 + $0x164] ss:$8 sps:$4 sm:$0xff]   ;;  %v3361_v15 = vld [vmem:[#allocation3 + $0x160] ss:$8 sps:$4 sm:$0xff]   ;;  %vm502_vm1 = vsmask.f32 3328 }
  0x58   : > { %vm3954_vm10 = vmor %vm327_vm7, %vm324_vm4  ;;  %v314_v16 = vld [vmem:[%s3952_s17] sm:$0xff]  ;;  %v315_v17 = vld [vmem:[%s3952_s17 + $0x8] sm:$0xff]  ;;  %vm503_vm2 = vsmask.f32 7440  ;;  %vm1068_vm4 = vcmask 1042432   ;;  %vm2414_vm7 = vcmask 261120  }
  0x59   : > { %vm3958_vm11 = vmor %vm344_vm9, %vm342_vm8  ;;  %v3362_v18 = vld [vmem:[#allocation3 + $0x174] ss:$8 sps:$4 sm:$0xff]   ;;  %v329_v21 = vld [vmem:[#allocation2] sm:$0x11]  ;;  %v3147_v22 = vpack.c.bf16 %v315_v17, %v314_v16  ;;  %vm2597_vm8 = vcmask 1041408   ;;  %vm3776_vm9 = vmmov 0  }
  0x5a   : > { %775 = vmatpush1.bf16.msra.mxu0 %v3349_v5  ;;  %v316_v19 = vld [vmem:[%s3952_s17 + $0x10] sm:$0xff]  ;;  %v317_v20 = vld [vmem:[%s3952_s17 + $0x18] sm:$0xff]  ;;  %v330_v23 = vsel %vm3954_vm10, 0, %v329_v21  ;;  %v346_v25 = vld [vmem:[#allocation2 + $0x8] sm:$0x11]  ;;  %s3777_s9 = smov 32  }
  0x5b   : > { %776 = vmatprep.subr.bf16.mxu0 %v3350_v6  ;;  %v332_v24 = vld [vmem:[#allocation2 + $0x10] sm:$0x11]  ;;  %v3148_v26 = vpack.c.bf16 %v317_v20, %v316_v19  ;;  %331 = vst [vmem:[#allocation2] sm:$0x11] %v330_v23  ;;  %v347_v28 = vsel %vm3958_vm11, 0, %v346_v25  ;;  %v394_v30 = vshrl.u32 %v3147_v22, 16  ;;  %vm434_vm14 = vmand %vm433_vm12, %vm341_vm5 }
  0x5c   : > { %v333_v27 = vsel %vm3954_vm10, 0, %v332_v24  ;;  %v349_v29 = vld [vmem:[#allocation2 + $0x18] sm:$0x11]  ;;  %v397_v31 = vshll.u32 %v3147_v22, 16  ;;  %348 = vst [vmem:[#allocation2 + $0x8] sm:$0x11] %v347_v28  ;;  %vm436_vm15 = vmand %vm435_vm13, %vm343_vm6 }
  0x5d   : > { %334 = vst [vmem:[#allocation2 + $0x10] sm:$0x11] %v333_v27  ;;  %v350_v32 = vsel %vm3958_vm11, 0, %v349_v29  ;;  %v402_v33 = vshrl.u32 %v3148_v26, 16  ;;  %v405_v34 = vshll.u32 %v3148_v26, 16  ;;  %v396_v35 = vrot.slane %v394_v30, 7  ;;  %vm3978_vm0 = vmor %vm436_vm15, %vm434_vm14 }
  0x5e   : > { %777 = vmatpush1.bf16.msra.mxu0 %v3352_v7  ;;  %351 = vst [vmem:[#allocation2 + $0x18] sm:$0x11] %v350_v32  ;;  %v3364_v36 = vld [vmem:[#allocation3 + $0x170] ss:$8 sps:$4 sm:$0xff]   ;;  %v3365_v38 = vld [vmem:[#allocation3 + $0x184] ss:$8 sps:$4 sm:$0xff]   ;;  %vm4005_vm3 = vmor %vm502_vm1, %vm503_vm2 }
  0x5f   : > { %778 = vmatprep.subr.bf16.mxu0 %v3353_v8  ;;  %v404_v37 = vrot.slane %v402_v33, 7  ;;  %v399_v39 = vor.u32 %v397_v31, %v396_v35  ;;  %v400_v40 = vrot.slane %v396_v35, 4  ;;  %v3367_v43 = vld [vmem:[#allocation3 + $0x180] ss:$8 sps:$4 sm:$0xff]   ;;  %v3368_v46 = vld [vmem:[#allocation3 + $0x194] ss:$8 sps:$4 sm:$0xff]  }
  0x60   : > { %v3370_v58 = vld [vmem:[#allocation3 + $0x190] ss:$8 sps:$4 sm:$0xff]   ;;  %v3371_v61 = vld [vmem:[#allocation3 + $0x1a4] ss:$8 sps:$4 sm:$0xff]   ;;  %v3373_v1 = vld [vmem:[#allocation3 + $0x1a0] ss:$8 sps:$4 sm:$0xff]  }
  0x61   : > { %v407_v41 = vor.u32 %v405_v34, %v404_v37  ;;  %v408_v44 = vrot.slane %v404_v37, 4  ;;  %v3374_v3 = vld [vmem:[#allocation3 + $0x1b4] ss:$8 sps:$4 sm:$0xff]   ;;  %v3376_v8 = vld [vmem:[#allocation3 + $0x1b0] ss:$8 sps:$4 sm:$0xff]   ;;  %v318_v21 = vld [vmem:[%s3952_s17 + $0x20] sm:$0xff] }
  0x62   : > { %779 = vmatpush1.bf16.msra.mxu0 %v3355_v9  ;;  %v438_v45 = vld [vmem:[#allocation2] sm:$0xff]  ;;  %v319_v22 = vld [vmem:[%s3952_s17 + $0x28] sm:$0xff]  ;;  %v320_v23 = vld [vmem:[%s3952_s17 + $0x30] sm:$0xff]  ;;  %vm1069_vm5 = vcmask 1046532   ;;  %s3778_s15 = smov 96   ;;  %s3779_s10 = smov 64  }
  0x63   : > { %780 = vmatprep.subr.bf16.mxu0 %v3356_v10  ;;  %v3984_v47 = vsel %vm3978_vm0, %v399_v39, %v438_v45  ;;  %v441_v48 = vld [vmem:[#allocation2 + $0x8] sm:$0x11]  ;;  %v321_v25 = vld [vmem:[%s3952_s17 + $0x38] sm:$0xff]  ;;  %v335_v26 = vld [vmem:[#allocation2 + $0x20] sm:$0x11]  ;;  %v3149_v28 = vpack.c.bf16 %v319_v22, %v318_v21  ;;  %vm2690_vm12 = vcmask 785408  }
  0x64   : > { %v444_v49 = vld [vmem:[#allocation2 + $0x10] sm:$0xff]  ;;  %440 = vst [vmem:[#allocation2] sm:$0xff] %v3984_v47  ;;  %v442_v50 = vsel %vm3954_vm10, %v400_v40, %v441_v48  ;;  %v506_v53 = vshrl.u32 %v3984_v47, 16  ;;  %v509_v54 = vshll.u32 %v3984_v47, 16  ;;  %v3379_v17 = vld [vmem:[#allocation3 + $0x1c0] ss:$8 sps:$4 sm:$0xff]   ;;  %v3150_v33 = vpack.c.bf16 %v321_v25, %v320_v23  ;;  %vm4070_vm6 = vmor %vm1068_vm4, %vm1069_vm5 }
  0x65   : > { %v3991_v51 = vsel %vm3978_vm0, %v407_v41, %v444_v49  ;;  %v447_v52 = vld [vmem:[#allocation2 + $0x18] sm:$0x11]  ;;  %443 = vst [vmem:[#allocation2 + $0x8] sm:$0x11] %v442_v50  ;;  %v338_v27 = vld [vmem:[#allocation2 + $0x30] sm:$0x11] }
  0x66   : > { %781 = vmatpush1.bf16.msra.mxu0 %v3358_v12  ;;  %446 = vst [vmem:[#allocation2 + $0x10] sm:$0xff] %v3991_v51  ;;  %v448_v55 = vsel %vm3954_vm10, %v408_v44, %v447_v52  ;;  %v520_v56 = vshrl.u32 %v3991_v51, 16  ;;  %v523_v57 = vshll.u32 %v3991_v51, 16  ;;  %v508_v59 = vrot.slane %v506_v53, 4  ;;  %v352_v31 = vld [vmem:[#allocation2 + $0x28] sm:$0x11] }
  0x67   : > { %782 = vmatprep.subr.bf16.mxu0 %v3359_v14  ;;  %449 = vst [vmem:[#allocation2 + $0x18] sm:$0x11] %v448_v55  ;;  %v511_v60 = vrot.slane %v509_v54, 5  ;;  %v3377_v14 = vld [vmem:[#allocation3 + $0x1c4] ss:$8 sps:$4 sm:$0xff]   ;;  %v336_v29 = vsel %vm3954_vm10, 0, %v335_v26 }
  0x68   : > { %v522_v62 = vrot.slane %v520_v56, 4  ;;  %v525_v63 = vrot.slane %v523_v57, 5  ;;  %v339_v30 = vsel %vm3954_vm10, 0, %v338_v27  ;;  %v355_v32 = vld [vmem:[#allocation2 + $0x38] sm:$0x11]  ;;  %v353_v34 = vsel %vm3958_vm11, 0, %v352_v31 }
  0x69   : > { %v512_v0 = vor.u32 %v511_v60, %v508_v59  ;;  %337 = vst [vmem:[#allocation2 + $0x20] sm:$0x11] %v336_v29  ;;  %340 = vst [vmem:[#allocation2 + $0x30] sm:$0x11] %v339_v30  ;;  %v356_v35 = vsel %vm3958_vm11, 0, %v355_v32  ;;  %v413_v37 = vshll.u32 %v3149_v28, 16  ;;  %v2945_v32 = vcombine.high %v3984_v47, %v3991_v51 }
  0x6a   : > { %783 = vmatpush1.bf16.msra.mxu0 %v3361_v15  ;;  %v526_v2 = vor.u32 %v525_v63, %v522_v62  ;;  %354 = vst [vmem:[#allocation2 + $0x28] sm:$0x11] %v353_v34  ;;  %357 = vst [vmem:[#allocation2 + $0x38] sm:$0x11] %v356_v35  ;;  %v418_v39 = vshrl.u32 %v3150_v33, 16  ;;  %v421_v40 = vshll.u32 %v3150_v33, 16 }
  0x6b   : > { %784 = vmatprep.subr.bf16.mxu0 %v3362_v18  ;;  %v513_v6 = vrot.slane %v512_v0, 4  ;;  %v3380_v18 = vld [vmem:[#allocation3 + $0x1d4] ss:$8 sps:$4 sm:$0xff]   ;;  %v3383_v41 = vld [vmem:[#allocation3 + $0x1e4] ss:$8 sps:$4 sm:$0xff]   ;;  %vm2688_vm11 = vcmask 523264  }
  0x6c   : > { %v4000_v4 = vld [vmem:[#allocation2 + $0x8] sm:$0x11]  ;;  %v527_v10 = vrot.slane %v526_v2, 4  ;;  %v420_v44 = vrot.slane %v418_v39, 7  ;;  %v3386_v13 = vld [vmem:[#allocation3 + $0x1f4] ss:$8 sps:$4 sm:$0xff]  }
  0x6d   : > { %v515_v7 = vshll.u32 %v4000_v4, 16  ;;  %v3391_v63 = vld [vmem:[#allocation3 + $0x4] ss:$8 sps:$4 sm:$0xff]   ;;  %v3395_v26 = vld [vmem:[#allocation3 + $0x20] ss:$8 sps:$4 sm:$0xff]   ;;  %s302_s19 = sand.u32 1, %s3761_s25  }
  0x6e   : > { %785 = vmatpush1.bf16.msra.mxu0 %v3364_v36  ;;  %v4002_v5 = vld [vmem:[#allocation2 + $0x18] sm:$0x11]  ;;  %v410_v36 = vshrl.u32 %v3149_v28, 16  ;;  %v423_v49 = vor.u32 %v421_v40, %v420_v44  ;;  %v424_v50 = vrot.slane %v420_v44, 4  ;;  %v3403_v34 = vld [vmem:[#allocation3 + $0x44] ss:$8 sps:$4 sm:$0xff]  }
  0x6f   : > { %786 = vmatprep.subr.bf16.mxu0 %v3365_v38  ;;  %v529_v12 = vshll.u32 %v4002_v5, 16  ;;  %v517_v15 = vrot.slane %v515_v7, 5  ;;  %v3382_v38 = vld [vmem:[#allocation3 + $0x1d0] ss:$8 sps:$4 sm:$0xff]   ;;  %v3400_v27 = vld [vmem:[#allocation3 + $0x34] ss:$8 sps:$4 sm:$0xff]  }
  0x70   : > { %v450_v52 = vld [vmem:[#allocation2 + $0x20] sm:$0xff]  ;;  %v456_v53 = vld [vmem:[#allocation2 + $0x30] sm:$0xff]  ;;  %s2897_s13 = sshll.u32 %s302_s19, 6  ;;  %s3156_s16 = sshll.u32 %s3845_s28, 10 }
  0x71   : > { %v531_v16 = vrot.slane %v529_v12, 5  ;;  %v4012_v19 = vsel %vm4005_vm3, %v513_v6, %v517_v15  ;;  %v453_v55 = vld [vmem:[#allocation2 + $0x28] sm:$0x11]  ;;  %v4038_v56 = vsel %vm3978_vm0, %v423_v49, %v456_v53  ;;  %v459_v57 = vld [vmem:[#allocation2 + $0x38] sm:$0x11]  ;;  %s304_s18 = scalar_lea.vmem [#allocation8], %s2897_s13  ;;  %s4387_s21 = scalar_lea.hbm %s4441_s7, %s3156_s16 }
  0x72   : > { %787 = vmatpush1.bf16.msra.mxu0 %v3367_v43  ;;  %v412_v43 = vrot.slane %v410_v36, 7  ;;  %458 = vst [vmem:[#allocation2 + $0x30] sm:$0xff] %v4038_v56  ;;  %v460_v60 = vsel %vm3954_vm10, %v424_v50, %v459_v57  ;;  %v548_v0 = vshrl.u32 %v4038_v56, 16  ;;  %v3394_v12 = vld [vmem:[#allocation3 + $0x14] ss:$8 sps:$4 sm:$0xff]   ;;  %s2805_s14 = sshll.u32 %s304_s18, 4  ;;  %s4389_s14 = int_to_ptr.vmem [resolvable:$true] %s2805_s14 }
  0x73   : > { %788 = vmatprep.subr.bf16.mxu0 %v3368_v46  ;;  %v4016_v20 = vsel %vm4005_vm3, %v527_v10, %v531_v16  ;;  %v3385_v46 = vld [vmem:[#allocation3 + $0x1e0] ss:$8 sps:$4 sm:$0xff]   ;;  %461 = vst [vmem:[#allocation2 + $0x38] sm:$0x11] %v460_v60  ;;  %v3392_v16 = vld [vmem:[#allocation3 + $0x10] ss:$8 sps:$4 sm:$0xff]  }
  0x74   : > { %v2909_v24 = vcombine.high %v4012_v19, %v4016_v20  ;;  %v415_v45 = vor.u32 %v413_v37, %v412_v43  ;;  %v416_v48 = vrot.slane %v412_v43, 4  ;;  %v2908_v6 = vcombine.low %v4012_v19, %v4016_v20  ;;  %v3389_v10 = vld [vmem:[#allocation3] ss:$8 sps:$4 sm:$0xff]   ;;  %v3398_v33 = vld [vmem:[#allocation3 + $0x30] ss:$8 sps:$4 sm:$0xff]   ;;  %s3699_s22 = scalar_lea.vmem %s4389_s14, 1024 }
  0x75   : > { %v550_v7 = vrot.slane %v548_v0, 4  ;;  %v3401_v35 = vld [vmem:[#allocation3 + $0x40] ss:$8 sps:$4 sm:$0xff]   ;;  %v3406_v36 = vld [vmem:[#allocation3 + $0x54] ss:$8 sps:$4 sm:$0xff]   ;;  %p3700_p10 = scmp.ne.s32.totalorder %s4389_s14, %s3699_s22  ;;  %p4465_p1 = scmp.ne.s32.totalorder %s4446_s11, 0 }
  0x76   : > { %789 = vmatpush1.bf16.msra.mxu0 %v3370_v58  ;;  %802 = vmatprep.mubr.bf16.mxu0 %v2909_v24  ;;  %v4034_v54 = vsel %vm3978_vm0, %v415_v45, %v450_v52  ;;  %v3388_v58 = vld [vmem:[#allocation3 + $0x1f0] ss:$8 sps:$4 sm:$0xff]   ;;  %v454_v59 = vsel %vm3954_vm10, %v416_v48, %v453_v55  ;;  %v3485_v37 = vld [vmem:[#allocation6 + $0x104] ss:$8 sps:$4 sm:$0xff]   ;;  %v3488_v39 = vld [vmem:[#allocation6 + $0x114] ss:$8 sps:$4 sm:$0xff]  }
  0x77   : > { %790 = vmatprep.subr.bf16.mxu0 %v3371_v61  ;;  %452 = vst [vmem:[#allocation2 + $0x20] sm:$0xff] %v4034_v54  ;;  %v534_v61 = vshrl.u32 %v4034_v54, 16  ;;  %v537_v62 = vshll.u32 %v4034_v54, 16  ;;  %455 = vst [vmem:[#allocation2 + $0x28] sm:$0x11] %v454_v59  ;;  %1791 = vmatprep.subr.bf16.mxu1 %v3485_v37  ;;  %p3701_p2 = pnand %p3700_p10, %p4465_p1  ;;  %s3781_s23 = smov [#allocation8]  }
  0x78   : > { %v3404_v40 = vld [vmem:[#allocation3 + $0x50] ss:$8 sps:$4 sm:$0xff]   ;;  %v3491_v43 = vld [vmem:[#allocation6 + $0x124] ss:$8 sps:$4 sm:$0xff]   ;;  %v3407_v45 = vld [vmem:[#allocation3 + $0x60] ss:$8 sps:$4 sm:$0xff]  }
  0x79   : > { %v536_v2 = vrot.slane %v534_v61, 4  ;;  %v3409_v44 = vld [vmem:[#allocation3 + $0x64] ss:$8 sps:$4 sm:$0xff]   ;;  %v3494_v48 = vld [vmem:[#allocation6 + $0x134] ss:$8 sps:$4 sm:$0xff]   ;;  %p3702_p3 = pneg %p3701_p2  ;;  %s3703_s29 = sshll.u32 %s3781_s23, 4  ;;  %s3704_s29 = int_to_ptr.vmem [resolvable:$false] %s3703_s29 }
  0x7a   : > { %791 = vmatpush1.bf16.msra.mxu0 %v3373_v1  ;;  %v551_v1 = vshll.u32 %v4038_v56, 16  ;;  %v4054_v21 = vld [vmem:[#allocation2 + $0x38] sm:$0x11]  ;;  %v3497_v52 = vld [vmem:[#allocation6 + $0x144] ss:$8 sps:$4 sm:$0xff]   ;;  %s3705_s8 = scalar_lea.vmem %s3704_s29, 2048  ;;  %p3706_p4 = scmp.lt.s32.totalorder %s4389_s14, %s3704_s29 }
  0x7b   : > { %792 = vmatprep.subr.bf16.mxu0 %v3374_v3  ;;  %v539_v3 = vrot.slane %v537_v62, 5  ;;  %v557_v23 = vshll.u32 %v4054_v21, 16  ;;  %v3412_v49 = vld [vmem:[#allocation3 + $0x74] ss:$8 sps:$4 sm:$0xff]   ;;  %v3496_v50 = vld [vmem:[#allocation6 + $0x130] ss:$8 sps:$4 sm:$0xff]   ;;  %p3707_p7 = scmp.lt.s32.totalorder %s3705_s8, %s3699_s22 }
  0x7c   : > { %v3415_v53 = vld [vmem:[#allocation3 + $0x84] ss:$8 sps:$4 sm:$0xff]   ;;  %v3499_v55 = vld [vmem:[#allocation6 + $0x140] ss:$8 sps:$4 sm:$0xff]   ;;  %v3418_v59 = vld [vmem:[#allocation3 + $0x94] ss:$8 sps:$4 sm:$0xff]  }
  0x7d   : > { %v559_v25 = vrot.slane %v557_v23, 5  ;;  %v3413_v57 = vld [vmem:[#allocation3 + $0x80] ss:$8 sps:$4 sm:$0xff]   ;;  %v3502_v60 = vld [vmem:[#allocation6 + $0x150] ss:$8 sps:$4 sm:$0xff]   ;;  %p3708_p8 = por %p3707_p7, %p3706_p4 }
  0x7e   : > { %793 = vmatpush1.bf16.msra.mxu0 %v3376_v8  ;;  %v553_v8 = vrot.slane %v551_v1, 5  ;;  %v3416_v61 = vld [vmem:[#allocation3 + $0x90] ss:$8 sps:$4 sm:$0xff]   ;;  %v3503_v62 = vld [vmem:[#allocation6 + $0x164] ss:$8 sps:$4 sm:$0xff]  }
  0x7f   : > { %794 = vmatprep.subr.bf16.mxu0 %v3377_v14  ;;  %v540_v14 = vor.u32 %v539_v3, %v536_v2  ;;  %v3505_v0 = vld [vmem:[#allocation6 + $0x160] ss:$8 sps:$4 sm:$0xff]   ;;  %v3424_v2 = vld [vmem:[#allocation3 + $0xb4] ss:$8 sps:$4 sm:$0xff]   ;;  %v3422_v3 = vld [vmem:[#allocation3 + $0xb0] ss:$8 sps:$4 sm:$0xff]   ;;  %p3709_p11 = pnand %p3708_p8, %p3702_p3 }
  0x80   : > { %v554_v15 = vor.u32 %v553_v8, %v550_v7  ;;  %v3419_v1 = vld [vmem:[#allocation3 + $0xa0] ss:$8 sps:$4 sm:$0xff]   ;;  %v3430_v8 = vld [vmem:[#allocation3 + $0xd4] ss:$8 sps:$4 sm:$0xff]   ;;  %v3542_v9 = vld [vmem:[#allocation6 + $0x30] ss:$8 sps:$4 sm:$0xff]  }
  0x81   : > { %v541_v22 = vrot.slane %v540_v14, 4  ;;  %v3425_v7 = vld [vmem:[#allocation3 + $0xc0] ss:$8 sps:$4 sm:$0xff]  }
  0x82   : > { %795 = vmatpush1.bf16.msra.mxu0 %v3379_v17  ;;  %v3397_v17 = vld [vmem:[#allocation3 + $0x24] ss:$8 sps:$4 sm:$0xff]   ;;  %v555_v20 = vrot.slane %v554_v15, 4  ;;  %v3431_v14 = vld [vmem:[#allocation3 + $0xe0] ss:$8 sps:$4 sm:$0xff]  }
  0x83   : > { %796 = vmatprep.subr.bf16.mxu0 %v3380_v18  ;;  %v4052_v18 = vld [vmem:[#allocation2 + $0x28] sm:$0x11]  ;;  %v3436_v15 = vld [vmem:[#allocation3 + $0xf4] ss:$8 sps:$4 sm:$0xff]  }
  0x84   : > { %v543_v19 = vshll.u32 %v4052_v18, 16  ;;  %v560_v29 = vsel %vm4005_vm3, %v555_v20, %v559_v25  ;;  %v2944_v20 = vcombine.low %v3984_v47, %v3991_v51  ;;  %v3437_v23 = vld [vmem:[#allocation3 + $0x200] ss:$8 sps:$4 sm:$0xff]   ;;  %v3442_v25 = vld [vmem:[#allocation3 + $0x214] ss:$8 sps:$4 sm:$0xff]  }
  0x85   : > { %v3440_v47 = vld [vmem:[#allocation3 + $0x210] ss:$8 sps:$4 sm:$0xff]   ;;  %v3445_v51 = vld [vmem:[#allocation3 + $0x224] ss:$8 sps:$4 sm:$0xff]   ;;  %v3449_v37 = vld [vmem:[#allocation3 + $0x240] ss:$8 sps:$4 sm:$0xff]  }
  0x86   : > { %797 = vmatpush1.bf16.msra.mxu0 %v3382_v38  ;;  %v545_v24 = vrot.slane %v543_v19, 5  ;;  %v3487_v38 = vld [vmem:[#allocation6 + $0x100] ss:$8 sps:$4 sm:$0xff]   ;;  %v1057_v19 = vld [vmem:[#allocation2 + $0x10] sm:$0xee] }
  0x87   : > { %798 = vmatprep.subr.bf16.mxu0 %v3383_v41  ;;  %1792 = vmatpush1.bf16.msra.mxu1 %v3487_v38  ;;  %v3490_v41 = vld [vmem:[#allocation6 + $0x110] ss:$8 sps:$4 sm:$0xff]   ;;  %v3454_v38 = vld [vmem:[#allocation3 + $0x254] ss:$8 sps:$4 sm:$0xff]  }
  0x88   : > { %v546_v28 = vsel %vm4005_vm3, %v541_v22, %v545_v24  ;;  %1793 = vmatprep.subr.bf16.mxu1 %v3488_v39  ;;  %v1056_v22 = vld [vmem:[#allocation2] sm:$0xee]  ;;  %v2947_v24 = vcombine.high %v4034_v54, %v4038_v56  ;;  %v3452_v39 = vld [vmem:[#allocation3 + $0x250] ss:$8 sps:$4 sm:$0xff]  }
  0x89   : > { %v2911_v30 = vcombine.high %v546_v28, %v560_v29  ;;  %v2910_v31 = vcombine.low %v546_v28, %v560_v29  ;;  %v2981_v28 = vrot.slane %v1057_v19, 9  ;;  %v1077_v29 = vrot.slane %v4002_v5, 5  ;;  %v3514_v19 = vld [vmem:[#allocation6 + $0x190] ss:$8 sps:$4 sm:$0xff]  }
  0x8a   : > { %799 = vmatpush1.bf16.msra.mxu0 %v3385_v46  ;;  %v3493_v46 = vld [vmem:[#allocation6 + $0x120] ss:$8 sps:$4 sm:$0xff]   ;;  %v2946_v5 = vcombine.low %v4034_v54, %v4038_v56 }
  0x8b   : > { %800 = vmatprep.subr.bf16.mxu0 %v3386_v13  ;;  %1794 = vmatpush1.bf16.msra.mxu1 %v3490_v41  ;;  %v3410_v13 = vld [vmem:[#allocation3 + $0x70] ss:$8 sps:$4 sm:$0xff]   ;;  %v3455_v41 = vld [vmem:[#allocation3 + $0x260] ss:$8 sps:$4 sm:$0xff]  }
  0x8c   : > { %1795 = vmatprep.subr.bf16.mxu1 %v3491_v43  ;;  %v3460_v43 = vld [vmem:[#allocation3 + $0x274] ss:$8 sps:$4 sm:$0xff]  }
  0x8e   : > { %801 = vmatpush1.bf16.msra.mxu0 %v3388_v58  ;;  %v3500_v58 = vld [vmem:[#allocation6 + $0x154] ss:$8 sps:$4 sm:$0xff]  }
  0x8f   : > { %1003 = vmatprep.subr.bf16.mxu0 %v3391_v63  ;;  %1796 = vmatpush1.bf16.msra.mxu1 %v3493_v46  ;;  %v3421_v63 = vld [vmem:[#allocation3 + $0xa4] ss:$8 sps:$4 sm:$0xff]   ;;  %v3461_v46 = vld [vmem:[#allocation3 + $0x280] ss:$8 sps:$4 sm:$0xff]  }
  0x90   : > { %1797 = vmatprep.subr.bf16.mxu1 %v3494_v48  ;;  %v3466_v48 = vld [vmem:[#allocation3 + $0x294] ss:$8 sps:$4 sm:$0xff]  }
  0x91   : > { %803 = vmatmul.mubr.bf16.vlgmr.msra.gmra.mrb[0].mxu0 %v2908_v6  ;;  %v3427_v6 = vld [vmem:[#allocation3 + $0xc4] ss:$8 sps:$4 sm:$0xff]  }
  0x92   : > { %1004 = vmatpush1.bf16.msra.mxu0 %v3389_v10  ;;  %812 = vmatprep.mubr.bf16.mxu0 %v2911_v30  ;;  %v3428_v10 = vld [vmem:[#allocation3 + $0xd0] ss:$8 sps:$4 sm:$0xff]   ;;  %v3544_v30 = vld [vmem:[#allocation6 + $0x34] ss:$8 sps:$4 sm:$0xff]  }
  0x93   : > { %1005 = vmatprep.subr.bf16.mxu0 %v3394_v12  ;;  %1798 = vmatpush1.bf16.msra.mxu1 %v3496_v50  ;;  %v3433_v12 = vld [vmem:[#allocation3 + $0xe4] ss:$8 sps:$4 sm:$0xff]  }
  0x94   : > { %1799 = vmatprep.subr.bf16.mxu1 %v3497_v52  ;;  %v3469_v50 = vld [vmem:[#allocation3 + $0x2a4] ss:$8 sps:$4 sm:$0xff]   ;;  %v3472_v52 = vld [vmem:[#allocation3 + $0x2b4] ss:$8 sps:$4 sm:$0xff]  }
  0x96   : > { %1006 = vmatpush1.bf16.msra.mxu0 %v3392_v16  ;;  %v3434_v16 = vld [vmem:[#allocation3 + $0xf0] ss:$8 sps:$4 sm:$0xff]  }
  0x97   : > { %1007 = vmatprep.subr.bf16.mxu0 %v3397_v17  ;;  %1800 = vmatpush1.bf16.msra.mxu1 %v3499_v55  ;;  %v3439_v17 = vld [vmem:[#allocation3 + $0x204] ss:$8 sps:$4 sm:$0xff]  }
  0x98   : > { %1801 = vmatprep.subr.bf16.mxu1 %v3500_v58  ;;  %v3475_v55 = vld [vmem:[#allocation3 + $0x2c4] ss:$8 sps:$4 sm:$0xff]   ;;  %v3478_v58 = vld [vmem:[#allocation3 + $0x2d4] ss:$8 sps:$4 sm:$0xff]  }
  0x99   : > { %813 = vmatmul.mubr.bf16.gmra.mrb[4].mxu0 %v2910_v31 }
  0x9a   : > { %1008 = vmatpush1.bf16.msra.mxu0 %v3395_v26  ;;  %1035 = vmatprep.mubr.bf16.mxu0 %v2945_v32  ;;  %v2980_v26 = vrot.slane %v1056_v22, 9  ;;  %v3443_v32 = vld [vmem:[#allocation3 + $0x220] ss:$8 sps:$4 sm:$0xff]   ;;  %v3512_v22 = vld [vmem:[#allocation6 + $0x194] ss:$8 sps:$4 sm:$0xff]  }
  0x9b   : > { %1009 = vmatprep.subr.bf16.mxu0 %v3400_v27  ;;  %1802 = vmatpush1.bf16.msra.mxu1 %v3502_v60  ;;  %v1073_v27 = vrot.slane %v4000_v4, 5  ;;  %v4080_v4 = vsel %vm4070_vm6, %v2981_v28, %v1077_v29  ;;  %v3481_v60 = vld [vmem:[#allocation3 + $0x2e4] ss:$8 sps:$4 sm:$0xff]   ;;  %v3524_v28 = vld [vmem:[#allocation6 + $0x1d4] ss:$8 sps:$4 sm:$0xff]  }
  0x9c   : > { %1803 = vmatprep.subr.bf16.mxu1 %v3503_v62  ;;  %v1059_v62 = vld [vmem:[#allocation2 + $0x30] sm:$0xee] }
  0x9d   : > { %v4076_v31 = vsel %vm4070_vm6, %v2980_v26, %v1073_v27  ;;  %v3521_v26 = vld [vmem:[#allocation6 + $0x1c4] ss:$8 sps:$4 sm:$0xff]   ;;  %v3523_v27 = vld [vmem:[#allocation6 + $0x1c0] ss:$8 sps:$4 sm:$0xff]   ;;  %v3526_v29 = vld [vmem:[#allocation6 + $0x1d0] ss:$8 sps:$4 sm:$0xff]  }
  0x9e   : > { %1010 = vmatpush1.bf16.msra.mxu0 %v3398_v33  ;;  %v2985_v33 = vcombine.high %v4076_v31, %v4080_v4 }
  0x9f   : > { %1011 = vmatprep.subr.bf16.mxu0 %v3403_v34  ;;  %1804 = vmatpush1.bf16.msra.mxu1 %v3505_v0  ;;  %v3448_v34 = vld [vmem:[#allocation3 + $0x234] ss:$8 sps:$4 sm:$0xff]  }
  0xa0   : > { %v3484_v0 = vld [vmem:[#allocation3 + $0x2f4] ss:$8 sps:$4 sm:$0xff]  }
  0xa2   : > { %1012 = vmatpush1.bf16.msra.mxu0 %v3401_v35  ;;  %v3446_v35 = vld [vmem:[#allocation3 + $0x230] ss:$8 sps:$4 sm:$0xff]  }
  0xa3   : > { %1013 = vmatprep.subr.bf16.mxu0 %v3406_v36  ;;  %v3451_v36 = vld [vmem:[#allocation3 + $0x244] ss:$8 sps:$4 sm:$0xff]  }
  0xa6   : > { %1014 = vmatpush1.bf16.msra.mxu0 %v3404_v40  ;;  %v3457_v40 = vld [vmem:[#allocation3 + $0x264] ss:$8 sps:$4 sm:$0xff]  }
  0xa7   : > { %1015 = vmatprep.subr.bf16.mxu0 %v3409_v44  ;;  %v3458_v44 = vld [vmem:[#allocation3 + $0x270] ss:$8 sps:$4 sm:$0xff]  }
  0xaa   : > { %1016 = vmatpush1.bf16.msra.mxu0 %v3407_v45  ;;  %v3463_v45 = vld [vmem:[#allocation3 + $0x284] ss:$8 sps:$4 sm:$0xff]  }
  0xab   : > { %1017 = vmatprep.subr.bf16.mxu0 %v3412_v49  ;;  %v3464_v49 = vld [vmem:[#allocation3 + $0x290] ss:$8 sps:$4 sm:$0xff]  }
  0xae   : > { %1018 = vmatpush1.bf16.msra.mxu0 %v3410_v13  ;;  %v3467_v13 = vld [vmem:[#allocation3 + $0x2a0] ss:$8 sps:$4 sm:$0xff]  }
  0xaf   : > { %1019 = vmatprep.subr.bf16.mxu0 %v3415_v53  ;;  %v3470_v53 = vld [vmem:[#allocation3 + $0x2b0] ss:$8 sps:$4 sm:$0xff]  }
  0xb2   : > { %1020 = vmatpush1.bf16.msra.mxu0 %v3413_v57  ;;  %v3473_v57 = vld [vmem:[#allocation3 + $0x2c0] ss:$8 sps:$4 sm:$0xff]  }
  0xb3   : > { %1021 = vmatprep.subr.bf16.mxu0 %v3418_v59  ;;  %v3476_v59 = vld [vmem:[#allocation3 + $0x2d0] ss:$8 sps:$4 sm:$0xff]  }
  0xb6   : > { %1022 = vmatpush1.bf16.msra.mxu0 %v3416_v61  ;;  %v1058_v61 = vld [vmem:[#allocation2 + $0x20] sm:$0xee] }
  0xb7   : > { %1023 = vmatprep.subr.bf16.mxu0 %v3421_v63  ;;  %v3479_v63 = vld [vmem:[#allocation3 + $0x2e0] ss:$8 sps:$4 sm:$0xff]  }
  0xba   : > { %1024 = vmatpush1.bf16.msra.mxu0 %v3419_v1  ;;  %v2982_v1 = vrot.slane %v1058_v61, 9 }
  0xbb   : > { %1025 = vmatprep.subr.bf16.mxu0 %v3424_v2  ;;  %v1081_v2 = vrot.slane %v4052_v18, 5 }
  0xbe   : > { %1026 = vmatpush1.bf16.msra.mxu0 %v3422_v3  ;;  %v2983_v3 = vrot.slane %v1059_v62, 9 }
  0xbf   : > { %1027 = vmatprep.subr.bf16.mxu0 %v3427_v6  ;;  %v1085_v6 = vrot.slane %v4054_v21, 5  ;;  %v3508_v21 = vld [vmem:[#allocation6 + $0x170] ss:$8 sps:$4 sm:$0xff]  }
  0xc2   : > { %1028 = vmatpush1.bf16.msra.mxu0 %v3425_v7  ;;  %v3482_v7 = vld [vmem:[#allocation3 + $0x2f0] ss:$8 sps:$4 sm:$0xff]  }
  0xc3   : > { %1029 = vmatprep.subr.bf16.mxu0 %v3430_v8  ;;  %v1082_v8 = vsel %vm4070_vm6, %v2982_v1, %v1081_v2 }
  0xc6   : > { %1030 = vmatpush1.bf16.msra.mxu0 %v3428_v10  ;;  %v1086_v10 = vsel %vm4070_vm6, %v2983_v3, %v1085_v6 }
  0xc7   : > { %1031 = vmatprep.subr.bf16.mxu0 %v3433_v12  ;;  %v2984_v12 = vcombine.low %v4076_v31, %v4080_v4  ;;  %v2986_v18 = vcombine.low %v1082_v8, %v1086_v10  ;;  %v3530_v31 = vld [vmem:[#allocation6 + $0x1f4] ss:$8 sps:$4 sm:$0xff]   ;;  %v3532_v4 = vld [vmem:[#allocation6 + $0x1f0] ss:$8 sps:$4 sm:$0xff]  }
  0xca   : > { %1032 = vmatpush1.bf16.msra.mxu0 %v3431_v14  ;;  %v2987_v14 = vcombine.high %v1082_v8, %v1086_v10 }
  0xcb   : > { %1033 = vmatprep.subr.bf16.mxu0 %v3436_v15  ;;  %v3506_v15 = vld [vmem:[#allocation6 + $0x174] ss:$8 sps:$4 sm:$0xff]  }
  0xcc   : > { %1805 = vmatprep.subr.bf16.mxu1 %v3506_v15 }
  0xcd   : > { %1806 = vmatpush1.bf16.msra.mxu1 %v3508_v21 }
  0xce   : > { %1034 = vmatpush1.bf16.msra.mxu0 %v3434_v16  ;;  %v3509_v16 = vld [vmem:[#allocation6 + $0x184] ss:$8 sps:$4 sm:$0xff]  }
  0xcf   : > { %1296 = vmatprep.subr.bf16.mxu0 %v3439_v17  ;;  %v3511_v17 = vld [vmem:[#allocation6 + $0x180] ss:$8 sps:$4 sm:$0xff]   ;;  %1807 = vmatprep.subr.bf16.mxu1 %v3509_v16 }
  0xd0   : > { %v1465_v16 = vld [vmem:[#allocation2 + $0x8] sm:$0x11] }
  0xd1   : > { %1036 = vmatmul.mubr.bf16.vlgmr.msra.gmra.mrb[0].mxu0 %v2944_v20  ;;  %1808 = vmatpush1.bf16.msra.mxu1 %v3511_v17  ;;  %v3515_v20 = vld [vmem:[#allocation6 + $0x1a4] ss:$8 sps:$4 sm:$0xff]  }
  0xd2   : > { %1297 = vmatpush1.bf16.msra.mxu0 %v3437_v23  ;;  %1045 = vmatprep.mubr.bf16.mxu0 %v2947_v24  ;;  %v3517_v23 = vld [vmem:[#allocation6 + $0x1a0] ss:$8 sps:$4 sm:$0xff]   ;;  %v3518_v24 = vld [vmem:[#allocation6 + $0x1b4] ss:$8 sps:$4 sm:$0xff]  }
  0xd3   : > { %1298 = vmatprep.subr.bf16.mxu0 %v3442_v25  ;;  %1809 = vmatprep.subr.bf16.mxu1 %v3512_v22  ;;  %v3520_v25 = vld [vmem:[#allocation6 + $0x1b0] ss:$8 sps:$4 sm:$0xff]  }
  0xd5   : > { %1810 = vmatpush1.bf16.msra.mxu1 %v3514_v19 }
  0xd6   : > { %1299 = vmatpush1.bf16.msra.mxu0 %v3440_v47  ;;  %1811 = vmatprep.subr.bf16.mxu1 %v3515_v20  ;;  %v3527_v47 = vld [vmem:[#allocation6 + $0x1e4] ss:$8 sps:$4 sm:$0xff]  }
  0xd7   : > { %1300 = vmatprep.subr.bf16.mxu0 %v3445_v51  ;;  %v3529_v51 = vld [vmem:[#allocation6 + $0x1e0] ss:$8 sps:$4 sm:$0xff]  }
  0xd9   : > { %1046 = vmatmul.mubr.bf16.gmra.mrb[4].mxu0 %v2946_v5  ;;  %1812 = vmatpush1.bf16.msra.mxu1 %v3517_v23  ;;  %v3535_v5 = vld [vmem:[#allocation6 + $0x4] ss:$8 sps:$4 sm:$0xff]  }
  0xda   : > { %1301 = vmatpush1.bf16.msra.mxu0 %v3443_v32  ;;  %1328 = vmatprep.mubr.bf16.mxu0 %v2985_v33  ;;  %v1358_v32 = vlaneseq }
  0xdb   : > { %1302 = vmatprep.subr.bf16.mxu0 %v3448_v34  ;;  %1813 = vmatprep.subr.bf16.mxu1 %v3518_v24 }
  0xdc   : > { %v4094_v33 = vshrl.u32 %v1358_v32, 7 }
  0xdd   : > { %1814 = vmatpush1.bf16.msra.mxu1 %v3520_v25 }
  0xde   : > { %1303 = vmatpush1.bf16.msra.mxu0 %v3446_v35  ;;  %1815 = vmatprep.subr.bf16.mxu1 %v3521_v26  ;;  %v4097_v34 = vsub.s32 0, %v4094_v33  ;;  %v358_v35 = vld [vmem:[%s4437_s3] ss:$4 sm:$0x3] }
  0xdf   : > { %1304 = vmatprep.subr.bf16.mxu0 %v3451_v36  ;;  %v4103_v36 = vsub.s32 1, %v4094_v33 }
  0xe1   : > { %1816 = vmatpush1.bf16.msra.mxu1 %v3523_v27  ;;  %v1471_v27 = vld [vmem:[#allocation2 + $0x18] sm:$0x11] }
  0xe2   : > { %1305 = vmatpush1.bf16.msra.mxu0 %v3449_v37  ;;  %1817 = vmatprep.subr.bf16.mxu1 %v3524_v28  ;;  %v2901_v37 = vld [vmem:[%s4437_s3 + $0x1] ss:$4 sm:$0x3] }
  0xe3   : > { %1306 = vmatprep.subr.bf16.mxu0 %v3454_v38  ;;  %v1361_v38 = vrot.slane %v358_v35, %v4097_v34 }
  0xe5   : > { %1818 = vmatpush1.bf16.msra.mxu1 %v3526_v29 }
  0xe6   : > { %1307 = vmatpush1.bf16.msra.mxu0 %v3452_v39  ;;  %1819 = vmatprep.subr.bf16.mxu1 %v3527_v47  ;;  %v1365_v39 = vrot.slane %v358_v35, %v4103_v36  ;;  %v3633_v47 = vld [vmem:[#allocation2] sm:$0xff] }
  0xe7   : > { %1308 = vmatprep.subr.bf16.mxu0 %v3457_v40  ;;  %v1380_v40 = vrot.slane %v2901_v37, %v4097_v34 }
  0xe9   : > { %1820 = vmatpush1.bf16.msra.mxu1 %v3529_v51 }
  0xea   : > { %1309 = vmatpush1.bf16.msra.mxu0 %v3455_v41  ;;  %1821 = vmatprep.subr.bf16.mxu1 %v3530_v31 }
  0xeb   : > { %1310 = vmatprep.subr.bf16.mxu0 %v3460_v43  ;;  %v1384_v43 = vrot.slane %v2901_v37, %v4103_v36 }
  0xed   : > { %1822 = vmatpush1.bf16.msra.mxu1 %v3532_v4 }
  0xee   : > { %1311 = vmatpush1.bf16.msra.mxu0 %v3458_v44  ;;  %2024 = vmatprep.subr.bf16.mxu1 %v3535_v5 }
  0xef   : > { %1312 = vmatprep.subr.bf16.mxu0 %v3463_v45 }
  0xf2   : > { %1313 = vmatpush1.bf16.msra.mxu0 %v3461_v46 }
  0xf3   : > { %1314 = vmatprep.subr.bf16.mxu0 %v3466_v48 }
  0xf6   : > { %1315 = vmatpush1.bf16.msra.mxu0 %v3464_v49 }
  0xf7   : > { %1316 = vmatprep.subr.bf16.mxu0 %v3469_v50 }
  0xfa   : > { %1317 = vmatpush1.bf16.msra.mxu0 %v3467_v13 }
  0xfb   : > { %1318 = vmatprep.subr.bf16.mxu0 %v3472_v52 }
  0xfe   : > { %1319 = vmatpush1.bf16.msra.mxu0 %v3470_v53 }
  0xff   : > { %1320 = vmatprep.subr.bf16.mxu0 %v3475_v55 }
 0x102   : > { %1321 = vmatpush1.bf16.msra.mxu0 %v3473_v57 }
 0x103   : > { %1322 = vmatprep.subr.bf16.mxu0 %v3478_v58 }
 0x106   : > { %1323 = vmatpush1.bf16.msra.mxu0 %v3476_v59 }
 0x107   : > { %1324 = vmatprep.subr.bf16.mxu0 %v3481_v60 }
 0x10a   : > { %1325 = vmatpush1.bf16.msra.mxu0 %v3479_v63 }
 0x10b   : > { %1326 = vmatprep.subr.bf16.mxu0 %v3484_v0 }
 0x10e   : > { %1327 = vmatpush1.bf16.msra.mxu0 %v3482_v7 }
 0x111   : > { %1329 = vmatmul.mubr.bf16.vlgmr.msra.gmra.mrb[0].mxu0 %v2984_v12 }
 0x112   : > { %1338 = vmatprep.mubr.bf16.mxu0 %v2987_v14 }
 0x119   : > { %1339 = vmatmul.mubr.bf16.gmra.mrb[4].mxu0 %v2986_v18 }
 0x1e4   : > { %v1330_v41 = vpop.f32.mrb[0].mxu0 }
 0x1e5   : > { %v1368_v44 = vmul.f32 %v1361_v38, %v1330_v41  ;;  %v1332_v45 = vpop.f32.mrb[1].mxu0 }
 0x1e6   : > { %v1369_v46 = vmul.f32 %v1365_v39, %v1332_v45  ;;  %v1334_v48 = vpop.f32.mrb[2].mxu0 }
 0x1e7   : > { %v1387_v49 = vadd.f32 %v1380_v40, %v1368_v44  ;;  %v1370_v50 = vmul.f32 %v1361_v38, %v1334_v48  ;;  %v1336_v13 = vpop.f32.mrb[3].mxu0 }
 0x1e8   : > { %v1388_v52 = vadd.f32 %v1384_v43, %v1369_v46  ;;  %v1371_v53 = vmul.f32 %v1365_v39, %v1336_v13 }
 0x1e9   : > { %v1395_v55 = vmax.f32 %v1387_v49, 0.0  ;;  %v1389_v57 = vadd.f32 %v1380_v40, %v1370_v50 }
 0x1ea   : > { %v1396_v58 = vmax.f32 %v1388_v52, 0.0  ;;  %v1390_v59 = vadd.f32 %v1384_v43, %v1371_v53 }
 0x1eb   : > { %v1397_v60 = vmax.f32 %v1389_v57, 0.0  ;;  %v1477_v57 = vld [vmem:[#allocation2 + $0x28] sm:$0x11] }
 0x1ec   : > { %v3151_v61 = vpack.c.bf16 %v1396_v58, %v1395_v55  ;;  %v1398_v62 = vmax.f32 %v1390_v59, 0.0  ;;  %v1340_v63 = vpop.f32.mrb[4].mxu0 }
 0x1ed   : > { %v1372_v0 = vmul.f32 %v1361_v38, %v1340_v63  ;;  %v1342_v1 = vpop.f32.mrb[5].mxu0 }
 0x1ee   : > { %v1424_v2 = vshrl.u32 %v3151_v61, 16  ;;  %v3152_v3 = vpack.c.bf16 %v1398_v62, %v1397_v60  ;;  %v1373_v6 = vmul.f32 %v1365_v39, %v1342_v1  ;;  %v1344_v7 = vpop.f32.mrb[6].mxu0  ;;  %v1427_v18 = vshll.u32 %v3151_v61, 16  ;;  %v1483_v1 = vld [vmem:[#allocation2 + $0x38] sm:$0x11] }
 0x1ef   : > { %v1391_v8 = vadd.f32 %v1380_v40, %v1372_v0  ;;  %v1374_v10 = vmul.f32 %v1361_v38, %v1344_v7  ;;  %v1346_v12 = vpop.f32.mrb[7].mxu0 }
 0x1f0   : > { %v1426_v14 = vrot.slane %v1424_v2, 7  ;;  %v1432_v15 = vshrl.u32 %v3152_v3, 16  ;;  %v1392_v21 = vadd.f32 %v1384_v43, %v1373_v6  ;;  %v1435_v17 = vshll.u32 %v3152_v3, 16 }
 0x1f1   : > { %v1399_v22 = vmax.f32 %v1391_v8, 0.0  ;;  %v1393_v19 = vadd.f32 %v1380_v40, %v1374_v10  ;;  %v1375_v20 = vmul.f32 %v1365_v39, %v1346_v12  ;;  %v3634_v39 = vld [vmem:[#allocation2 + $0x10] sm:$0xff] }
 0x1f2   : > { %v1429_v23 = vor.u32 %v1427_v18, %v1426_v14  ;;  %v1430_v24 = vrot.slane %v1426_v14, 4  ;;  %v1434_v25 = vrot.slane %v1432_v15, 7  ;;  %v1400_v26 = vmax.f32 %v1392_v21, 0.0 }
 0x1f3   : > { %v1401_v28 = vmax.f32 %v1393_v19, 0.0  ;;  %v1394_v29 = vadd.f32 %v1384_v43, %v1375_v20 }
 0x1f4   : > { %v4114_v51 = vsel %vm3978_vm0, %v1429_v23, %v3633_v47  ;;  %v1466_v31 = vsel %vm3954_vm10, %v1430_v24, %v1465_v16  ;;  %v1437_v4 = vor.u32 %v1435_v17, %v1434_v25  ;;  %v1438_v5 = vrot.slane %v1434_v25, 4 }
 0x1f5   : > { %1464 = vst [vmem:[#allocation2] sm:$0xff] %v4114_v51  ;;  %1467 = vst [vmem:[#allocation2 + $0x8] sm:$0x11] %v1466_v31  ;;  %v3153_v32 = vpack.c.bf16 %v1400_v26, %v1399_v22  ;;  %v1402_v35 = vmax.f32 %v1394_v29, 0.0  ;;  %v1527_v37 = vshrl.u32 %v4114_v51, 16  ;;  %v1530_v38 = vshll.u32 %v4114_v51, 16 }
 0x1f6   : > { %v4123_v40 = vsel %vm3978_vm0, %v1437_v4, %v3634_v39  ;;  %v1472_v41 = vsel %vm3954_vm10, %v1438_v5, %v1471_v27  ;;  %v3533_v39 = vld [vmem:[#allocation6] ss:$8 sps:$4 sm:$0xff]  }
 0x1f7   : > { %1470 = vst [vmem:[#allocation2 + $0x10] sm:$0xff] %v4123_v40  ;;  %1473 = vst [vmem:[#allocation2 + $0x18] sm:$0x11] %v1472_v41  ;;  %v1440_v43 = vshrl.u32 %v3153_v32, 16  ;;  %v3154_v44 = vpack.c.bf16 %v1402_v35, %v1401_v28  ;;  %v1529_v45 = vrot.slane %v1527_v37, 4  ;;  %v1532_v46 = vrot.slane %v1530_v38, 5 }
 0x1f8   : > { %v1541_v48 = vshrl.u32 %v4123_v40, 16  ;;  %v1544_v49 = vshll.u32 %v4123_v40, 16  ;;  %v3061_v50 = vcombine.high %v4114_v51, %v4123_v40  ;;  %v1443_v52 = vshll.u32 %v3153_v32, 16  ;;  %v3538_v41 = vld [vmem:[#allocation6 + $0x14] ss:$8 sps:$4 sm:$0xff]  }
 0x1f9   : > { %v1442_v13 = vrot.slane %v1440_v43, 7  ;;  %v1448_v53 = vshrl.u32 %v3154_v44, 16  ;;  %v3060_v55 = vcombine.low %v4114_v51, %v4123_v40  ;;  %v1533_v58 = vor.u32 %v1532_v46, %v1529_v45  ;;  %v3590_v51 = vld [vmem:[#allocation6 + $0x230] ss:$8 sps:$4 sm:$0xff]   ;;  %v3595_v40 = vld [vmem:[#allocation6 + $0x244] ss:$8 sps:$4 sm:$0xff]  }
 0x1fa   : > { %v1543_v59 = vrot.slane %v1541_v48, 4  ;;  %v1546_v60 = vrot.slane %v1544_v49, 5  ;;  %v1451_v0 = vshll.u32 %v3154_v44, 16 }
 0x1fb   : > { %v1445_v61 = vor.u32 %v1443_v52, %v1442_v13  ;;  %v1446_v62 = vrot.slane %v1442_v13, 4  ;;  %v1450_v63 = vrot.slane %v1448_v53, 7  ;;  %v1534_v3 = vrot.slane %v1533_v58, 4 }
 0x1fc   : > { %v1522_v2 = vld [vmem:[#allocation2 + $0x8] sm:$0x11]  ;;  %v1547_v6 = vor.u32 %v1546_v60, %v1543_v59  ;;  %v2077_v20 = vld [vmem:[#allocation2] sm:$0xee]  ;;  %v3536_v60 = vld [vmem:[#allocation6 + $0x10] ss:$8 sps:$4 sm:$0xff]  }
 0x1fd   : > { %v4137_v7 = vsel %vm3978_vm0, %v1445_v61, %v4034_v54  ;;  %v1478_v8 = vsel %vm3954_vm10, %v1446_v62, %v1477_v57  ;;  %v1453_v10 = vor.u32 %v1451_v0, %v1450_v63  ;;  %v1454_v12 = vrot.slane %v1450_v63, 4 }
 0x1fe   : > { %1476 = vst [vmem:[#allocation2 + $0x20] sm:$0xff] %v4137_v7  ;;  %1479 = vst [vmem:[#allocation2 + $0x28] sm:$0x11] %v1478_v8  ;;  %v1523_v14 = vld [vmem:[#allocation2 + $0x18] sm:$0x11]  ;;  %v1536_v18 = vshll.u32 %v1522_v2, 16 }
 0x1ff   : > { %v1548_v15 = vrot.slane %v1547_v6, 4  ;;  %v2091_v21 = vrot.slane %v1522_v2, 5  ;;  %v1555_v16 = vshrl.u32 %v4137_v7, 16  ;;  %v4146_v17 = vsel %vm3978_vm0, %v1453_v10, %v4038_v56  ;;  %v2078_v27 = vld [vmem:[#allocation2 + $0x10] sm:$0xee] }
 0x200   : > { %v1484_v54 = vsel %vm3954_vm10, %v1454_v12, %v1483_v1  ;;  %v1550_v22 = vshll.u32 %v1523_v14, 16  ;;  %v2095_v19 = vrot.slane %v1523_v14, 5  ;;  %1482 = vst [vmem:[#allocation2 + $0x30] sm:$0xff] %v4146_v17  ;;  %v1538_v23 = vrot.slane %v1536_v18, 5  ;;  %v3541_v1 = vld [vmem:[#allocation6 + $0x24] ss:$8 sps:$4 sm:$0xff]  }
 0x201   : > { %1485 = vst [vmem:[#allocation2 + $0x38] sm:$0x11] %v1484_v54  ;;  %v1557_v24 = vrot.slane %v1555_v16, 4  ;;  %v1558_v25 = vshll.u32 %v4137_v7, 16  ;;  %v1569_v26 = vshrl.u32 %v4146_v17, 16  ;;  %v1572_v42 = vshll.u32 %v4146_v17, 16 }
 0x202   : > { %v1552_v28 = vrot.slane %v1550_v22, 5  ;;  %v3063_v11 = vcombine.high %v4137_v7, %v4146_v17  ;;  %v3062_v56 = vcombine.low %v4137_v7, %v4146_v17  ;;  %v3096_v31 = vrot.slane %v2077_v20, 9  ;;  %v3539_v54 = vld [vmem:[#allocation6 + $0x20] ss:$8 sps:$4 sm:$0xff]   ;;  %v3604_v7 = vld [vmem:[#allocation6 + $0x274] ss:$8 sps:$4 sm:$0xff]  }
 0x203   : > { %v1560_v29 = vrot.slane %v1558_v25, 5  ;;  %v1571_v47 = vrot.slane %v1569_v26, 4  ;;  %v1539_v4 = vsel %vm4005_vm3, %v1534_v3, %v1538_v23  ;;  %v1574_v32 = vrot.slane %v1572_v42, 5  ;;  %v3545_v20 = vld [vmem:[#allocation6 + $0x40] ss:$8 sps:$4 sm:$0xff]  }
 0x204   : > { %v1553_v5 = vsel %vm4005_vm3, %v1548_v15, %v1552_v28  ;;  %v3097_v35 = vrot.slane %v2078_v27, 9  ;;  %v4164_v45 = vsel %vm4070_vm6, %v3096_v31, %v2091_v21  ;;  %v3550_v23 = vld [vmem:[#allocation6 + $0x54] ss:$8 sps:$4 sm:$0xff]   ;;  %v3553_v25 = vld [vmem:[#allocation6 + $0x64] ss:$8 sps:$4 sm:$0xff]   ;;  %vm2593_vm10 = vcmask 15360  }
 0x205   : > { %v3024_v37 = vcombine.low %v1539_v4, %v1553_v5  ;;  %v3025_v38 = vcombine.high %v1539_v4, %v1553_v5  ;;  %v1524_v43 = vld [vmem:[#allocation2 + $0x28] sm:$0x11]  ;;  %v1561_v44 = vor.u32 %v1560_v29, %v1557_v24  ;;  %v2079_v48 = vld [vmem:[#allocation2 + $0x20] sm:$0xee]  ;;  %v1575_v13 = vor.u32 %v1574_v32, %v1571_v47  ;;  %v3548_v24 = vld [vmem:[#allocation6 + $0x50] ss:$8 sps:$4 sm:$0xff]  }
 0x206   : > { %v4168_v46 = vsel %vm4070_vm6, %v3097_v35, %v2095_v19  ;;  %v1564_v49 = vshll.u32 %v1524_v43, 16  ;;  %v3098_v59 = vrot.slane %v2079_v48, 9  ;;  %v2099_v63 = vrot.slane %v1524_v43, 5  ;;  %v3547_v19 = vld [vmem:[#allocation6 + $0x44] ss:$8 sps:$4 sm:$0xff]  }
 0x207   : > { %1823 = vmatprep.mubr.bf16.mxu1 %v3025_v38  ;;  %v3100_v52 = vcombine.low %v4164_v45, %v4168_v46  ;;  %v3101_v53 = vcombine.high %v4164_v45, %v4168_v46  ;;  %v2080_v58 = vld [vmem:[#allocation2 + $0x30] sm:$0xee]  ;;  %v1562_v3 = vrot.slane %v1561_v44, 4  ;;  %v1576_v6 = vrot.slane %v1575_v13, 4  ;;  %v3551_v26 = vld [vmem:[#allocation6 + $0x60] ss:$8 sps:$4 sm:$0xff]  }
 0x208   : > { %1824 = vmatmul.mubr.bf16.vlgmr.msra.gmra.mrb[0].mxu1 %v3024_v37  ;;  %v1525_v57 = vld [vmem:[#allocation2 + $0x38] sm:$0x11]  ;;  %v1566_v61 = vrot.slane %v1564_v49, 5  ;;  %v3099_v0 = vrot.slane %v2080_v58, 9  ;;  %v4176_v10 = vsel %vm4070_vm6, %v3098_v59, %v2099_v63  ;;  %v3559_v42 = vld [vmem:[#allocation6 + $0x84] ss:$8 sps:$4 sm:$0xff]  }
 0x209   : > { %2025 = vmatpush1.bf16.msra.mxu1 %v3533_v39  ;;  %v1578_v62 = vshll.u32 %v1525_v57, 16  ;;  %v2103_v2 = vrot.slane %v1525_v57, 5  ;;  %v3556_v27 = vld [vmem:[#allocation6 + $0x74] ss:$8 sps:$4 sm:$0xff]   ;;  %v3554_v28 = vld [vmem:[#allocation6 + $0x70] ss:$8 sps:$4 sm:$0xff]  }
 0x20a   : > { %2026 = vmatprep.subr.bf16.mxu1 %v3538_v41  ;;  %v1567_v14 = vsel %vm4005_vm3, %v1562_v3, %v1566_v61  ;;  %v3562_v29 = vld [vmem:[#allocation6 + $0x94] ss:$8 sps:$4 sm:$0xff]   ;;  %v3560_v47 = vld [vmem:[#allocation6 + $0x90] ss:$8 sps:$4 sm:$0xff]   ;;  %v3565_v31 = vld [vmem:[#allocation6 + $0xa4] ss:$8 sps:$4 sm:$0xff]  }
 0x20b   : > { %v1580_v8 = vrot.slane %v1578_v62, 5  ;;  %v4180_v12 = vsel %vm4070_vm6, %v3099_v0, %v2103_v2  ;;  %v3563_v4 = vld [vmem:[#allocation6 + $0xa0] ss:$8 sps:$4 sm:$0xff]   ;;  %v3568_v5 = vld [vmem:[#allocation6 + $0xb4] ss:$8 sps:$4 sm:$0xff]  }
 0x20c   : > { %v3103_v15 = vcombine.high %v4176_v10, %v4180_v12  ;;  %v3102_v21 = vcombine.low %v4176_v10, %v4180_v12  ;;  %v3566_v32 = vld [vmem:[#allocation6 + $0xb0] ss:$8 sps:$4 sm:$0xff]   ;;  %v3571_v35 = vld [vmem:[#allocation6 + $0xc4] ss:$8 sps:$4 sm:$0xff]   ;;  %v3569_v37 = vld [vmem:[#allocation6 + $0xc0] ss:$8 sps:$4 sm:$0xff]  }
 0x20d   : > { %2027 = vmatpush1.bf16.msra.mxu1 %v3536_v60  ;;  %v1581_v18 = vsel %vm4005_vm3, %v1576_v6, %v1580_v8  ;;  %v3574_v38 = vld [vmem:[#allocation6 + $0xd4] ss:$8 sps:$4 sm:$0xff]   ;;  %v3572_v39 = vld [vmem:[#allocation6 + $0xd0] ss:$8 sps:$4 sm:$0xff]   ;;  %v3577_v41 = vld [vmem:[#allocation6 + $0xe4] ss:$8 sps:$4 sm:$0xff]  }
 0x20e   : > { %v3027_v16 = vcombine.high %v1567_v14, %v1581_v18  ;;  %2028 = vmatprep.subr.bf16.mxu1 %v3541_v1  ;;  %v3026_v22 = vcombine.low %v1567_v14, %v1581_v18  ;;  %v3575_v43 = vld [vmem:[#allocation6 + $0xe0] ss:$8 sps:$4 sm:$0xff]   ;;  %v3580_v44 = vld [vmem:[#allocation6 + $0xf4] ss:$8 sps:$4 sm:$0xff]   ;;  %v3578_v48 = vld [vmem:[#allocation6 + $0xf0] ss:$8 sps:$4 sm:$0xff]  }
 0x20f   : > { %v3583_v49 = vld [vmem:[#allocation6 + $0x204] ss:$8 sps:$4 sm:$0xff]   ;;  %v3581_v13 = vld [vmem:[#allocation6 + $0x200] ss:$8 sps:$4 sm:$0xff]   ;;  %v3586_v57 = vld [vmem:[#allocation6 + $0x214] ss:$8 sps:$4 sm:$0xff]  }
 0x210   : > { %1833 = vmatprep.mubr.bf16.mxu1 %v3027_v16  ;;  %v3584_v58 = vld [vmem:[#allocation6 + $0x210] ss:$8 sps:$4 sm:$0xff]   ;;  %v3589_v59 = vld [vmem:[#allocation6 + $0x224] ss:$8 sps:$4 sm:$0xff]   ;;  %v3587_v60 = vld [vmem:[#allocation6 + $0x220] ss:$8 sps:$4 sm:$0xff]  }
 0x211   : > { %1834 = vmatmul.mubr.bf16.gmra.mrb[4].mxu1 %v3026_v22  ;;  %v3592_v61 = vld [vmem:[#allocation6 + $0x234] ss:$8 sps:$4 sm:$0xff]   ;;  %v3596_v62 = vld [vmem:[#allocation6 + $0x250] ss:$8 sps:$4 sm:$0xff]   ;;  %v3601_v63 = vld [vmem:[#allocation6 + $0x264] ss:$8 sps:$4 sm:$0xff]  }
 0x212   : > { %2029 = vmatpush1.bf16.msra.mxu1 %v3539_v54  ;;  %2056 = vmatprep.mubr.bf16.mxu1 %v3061_v50  ;;  %v3557_v50 = vld [vmem:[#allocation6 + $0x80] ss:$8 sps:$4 sm:$0xff]   ;;  %v3602_v17 = vld [vmem:[#allocation6 + $0x270] ss:$8 sps:$4 sm:$0xff]   ;;  %v3610_v1 = vld [vmem:[#allocation6 + $0x294] ss:$8 sps:$4 sm:$0xff]  }
 0x213   : > { %2030 = vmatprep.subr.bf16.mxu1 %v3544_v30  ;;  %v3599_v0 = vld [vmem:[#allocation6 + $0x260] ss:$8 sps:$4 sm:$0xff]   ;;  %v3608_v2 = vld [vmem:[#allocation6 + $0x290] ss:$8 sps:$4 sm:$0xff]   ;;  %v3613_v3 = vld [vmem:[#allocation6 + $0x2a4] ss:$8 sps:$4 sm:$0xff]  }
 0x214   : > { %v3611_v6 = vld [vmem:[#allocation6 + $0x2a0] ss:$8 sps:$4 sm:$0xff]   ;;  %v3616_v8 = vld [vmem:[#allocation6 + $0x2b4] ss:$8 sps:$4 sm:$0xff]   ;;  %v3614_v14 = vld [vmem:[#allocation6 + $0x2b0] ss:$8 sps:$4 sm:$0xff]  }
 0x215   : > { %v3619_v18 = vld [vmem:[#allocation6 + $0x2c4] ss:$8 sps:$4 sm:$0xff]   ;;  %v3617_v16 = vld [vmem:[#allocation6 + $0x2c0] ss:$8 sps:$4 sm:$0xff]   ;;  %v3622_v54 = vld [vmem:[#allocation6 + $0x2d4] ss:$8 sps:$4 sm:$0xff]  }
 0x216   : > { %2031 = vmatpush1.bf16.msra.mxu1 %v3542_v9  ;;  %v3620_v22 = vld [vmem:[#allocation6 + $0x2d0] ss:$8 sps:$4 sm:$0xff]   ;;  %v3625_v30 = vld [vmem:[#allocation6 + $0x2e4] ss:$8 sps:$4 sm:$0xff]   ;;  %v3623_v9 = vld [vmem:[#allocation6 + $0x2e0] ss:$8 sps:$4 sm:$0xff]  }
 0x217   : > { %2032 = vmatprep.subr.bf16.mxu1 %v3547_v19  ;;  %v3628_v19 = vld [vmem:[#allocation6 + $0x2f4] ss:$8 sps:$4 sm:$0xff]   ;;  %v2506_v45 = vld [vmem:[%s4438_s4 + $0x88] sm:$0xff]  ;;  %v2489_v46 = vld [vmem:[%s4438_s4] sm:$0xff] }
 0x218   : > { %v2490_v10 = vld [vmem:[%s4438_s4 + $0x8] sm:$0xff]  ;;  %v2507_v12 = vld [vmem:[%s4438_s4 + $0x90] sm:$0xff] }
 0x21a   : > { %2033 = vmatpush1.bf16.msra.mxu1 %v3545_v20  ;;  %v3626_v20 = vld [vmem:[#allocation6 + $0x2f0] ss:$8 sps:$4 sm:$0xff]  }
 0x21b   : > { %2034 = vmatprep.subr.bf16.mxu1 %v3550_v23  ;;  %v3775_v23 = vmov 0.0  }
 0x21c   : > { %2482 = vmatprep.mubr.f32.mxu0 %v3775_v23 }
 0x21e   : > { %2035 = vmatpush1.bf16.msra.mxu1 %v3548_v24  ;;  %v2505_v24 = vld [vmem:[%s4438_s4 + $0x80] sm:$0xff] }
 0x21f   : > { %2036 = vmatprep.subr.bf16.mxu1 %v3553_v25 }
 0x222   : > { %2037 = vmatpush1.bf16.msra.mxu1 %v3551_v26  ;;  %v2491_v26 = vld [vmem:[%s4438_s4 + $0x10] sm:$0xff] }
 0x223   : > { %2038 = vmatprep.subr.bf16.mxu1 %v3556_v27  ;;  %v2492_v27 = vld [vmem:[%s4438_s4 + $0x18] sm:$0xff] }
 0x226   : > { %2039 = vmatpush1.bf16.msra.mxu1 %v3554_v28  ;;  %v2509_v28 = vld [vmem:[%s4438_s4 + $0xa0] sm:$0xff] }
 0x227   : > { %2040 = vmatprep.subr.bf16.mxu1 %v3559_v42  ;;  %v2510_v42 = vld [vmem:[%s4438_s4 + $0xa8] sm:$0xff] }
 0x22a   : > { %2041 = vmatpush1.bf16.msra.mxu1 %v3557_v50  ;;  %v3213_v50 = vpack.c.bf16 %v2492_v27, %v2491_v26 }
 0x22b   : > { %2042 = vmatprep.subr.bf16.mxu1 %v3562_v29  ;;  %v3215_v29 = vpack.c.bf16 %v2510_v42, %v2509_v28 }
 0x22e   : > { %2043 = vmatpush1.bf16.msra.mxu1 %v3560_v47  ;;  %v2493_v47 = vld [vmem:[%s4438_s4 + $0x20] sm:$0xff] }
 0x22f   : > { %2044 = vmatprep.subr.bf16.mxu1 %v3565_v31  ;;  %v2494_v31 = vld [vmem:[%s4438_s4 + $0x28] sm:$0xff] }
 0x232   : > { %2045 = vmatpush1.bf16.msra.mxu1 %v3563_v4  ;;  %v2511_v4 = vld [vmem:[%s4438_s4 + $0xb0] sm:$0xff] }
 0x233   : > { %2046 = vmatprep.subr.bf16.mxu1 %v3568_v5  ;;  %v2512_v5 = vld [vmem:[%s4438_s4 + $0xb8] sm:$0xff] }
 0x236   : > { %2047 = vmatpush1.bf16.msra.mxu1 %v3566_v32  ;;  %v3217_v32 = vpack.c.bf16 %v2494_v31, %v2493_v47 }
 0x237   : > { %2048 = vmatprep.subr.bf16.mxu1 %v3571_v35  ;;  %v3219_v35 = vpack.c.bf16 %v2512_v5, %v2511_v4 }
 0x23a   : > { %2049 = vmatpush1.bf16.msra.mxu1 %v3569_v37  ;;  %v2495_v37 = vld [vmem:[%s4438_s4 + $0x30] sm:$0xff] }
 0x23b   : > { %2050 = vmatprep.subr.bf16.mxu1 %v3574_v38  ;;  %v2496_v38 = vld [vmem:[%s4438_s4 + $0x38] sm:$0xff] }
 0x23e   : > { %2051 = vmatpush1.bf16.msra.mxu1 %v3572_v39  ;;  %v2513_v39 = vld [vmem:[%s4438_s4 + $0xc0] sm:$0xff] }
 0x23f   : > { %2052 = vmatprep.subr.bf16.mxu1 %v3577_v41  ;;  %v2514_v41 = vld [vmem:[%s4438_s4 + $0xc8] sm:$0xff] }
 0x242   : > { %2053 = vmatpush1.bf16.msra.mxu1 %v3575_v43  ;;  %v3221_v43 = vpack.c.bf16 %v2496_v38, %v2495_v37  ;;  %v2504_v37 = vld [vmem:[%s4438_s4 + $0x78] sm:$0xff] }
 0x243   : > { %2054 = vmatprep.subr.bf16.mxu1 %v3580_v44  ;;  %v3223_v44 = vpack.c.bf16 %v2514_v41, %v2513_v39 }
 0x246   : > { %2055 = vmatpush1.bf16.msra.mxu1 %v3578_v48  ;;  %v2497_v48 = vld [vmem:[%s4438_s4 + $0x40] sm:$0xff] }
 0x247   : > { %2314 = vmatprep.subr.bf16.mxu1 %v3583_v49  ;;  %v2498_v49 = vld [vmem:[%s4438_s4 + $0x48] sm:$0xff] }
 0x249   : > { %2057 = vmatmul.mubr.bf16.vlgmr.msra.gmra.mrb[0].mxu1 %v3060_v55  ;;  %v3593_v55 = vld [vmem:[#allocation6 + $0x240] ss:$8 sps:$4 sm:$0xff]  }
 0x24a   : > { %2066 = vmatprep.mubr.bf16.mxu1 %v3063_v11  ;;  %2315 = vmatpush1.bf16.msra.mxu1 %v3581_v13  ;;  %v3598_v11 = vld [vmem:[#allocation6 + $0x254] ss:$8 sps:$4 sm:$0xff]  }
 0x24b   : > { %2316 = vmatprep.subr.bf16.mxu1 %v3586_v57  ;;  %v2515_v13 = vld [vmem:[%s4438_s4 + $0xd0] sm:$0xff]  ;;  %v2516_v57 = vld [vmem:[%s4438_s4 + $0xd8] sm:$0xff] }
 0x24e   : > { %2317 = vmatpush1.bf16.msra.mxu1 %v3584_v58  ;;  %v3225_v58 = vpack.c.bf16 %v2498_v49, %v2497_v48 }
 0x24f   : > { %2318 = vmatprep.subr.bf16.mxu1 %v3589_v59  ;;  %v3227_v59 = vpack.c.bf16 %v2516_v57, %v2515_v13 }
 0x251   : > { %2067 = vmatmul.mubr.bf16.gmra.mrb[4].mxu1 %v3062_v56  ;;  %v3607_v56 = vld [vmem:[#allocation6 + $0x284] ss:$8 sps:$4 sm:$0xff]  }
 0x252   : > { %2319 = vmatpush1.bf16.msra.mxu1 %v3587_v60  ;;  %2346 = vmatprep.mubr.bf16.mxu1 %v3101_v53  ;;  %v3605_v53 = vld [vmem:[#allocation6 + $0x280] ss:$8 sps:$4 sm:$0xff]   ;;  %v2499_v60 = vld [vmem:[%s4438_s4 + $0x50] sm:$0xff] }
 0x253   : > { %2320 = vmatprep.subr.bf16.mxu1 %v3592_v61  ;;  %v2500_v61 = vld [vmem:[%s4438_s4 + $0x58] sm:$0xff] }
 0x256   : > { %2321 = vmatpush1.bf16.msra.mxu1 %v3590_v51  ;;  %v2517_v51 = vld [vmem:[%s4438_s4 + $0xe0] sm:$0xff] }
 0x257   : > { %2322 = vmatprep.subr.bf16.mxu1 %v3595_v40  ;;  %v2518_v40 = vld [vmem:[%s4438_s4 + $0xe8] sm:$0xff] }
 0x25a   : > { %2323 = vmatpush1.bf16.msra.mxu1 %v3593_v55  ;;  %v3229_v55 = vpack.c.bf16 %v2500_v61, %v2499_v60 }
 0x25b   : > { %2324 = vmatprep.subr.bf16.mxu1 %v3598_v11  ;;  %v3231_v11 = vpack.c.bf16 %v2518_v40, %v2517_v51 }
 0x25e   : > { %2325 = vmatpush1.bf16.msra.mxu1 %v3596_v62  ;;  %v2501_v62 = vld [vmem:[%s4438_s4 + $0x60] sm:$0xff] }
 0x25f   : > { %2326 = vmatprep.subr.bf16.mxu1 %v3601_v63  ;;  %v2502_v63 = vld [vmem:[%s4438_s4 + $0x68] sm:$0xff] }
 0x262   : > { %2327 = vmatpush1.bf16.msra.mxu1 %v3599_v0  ;;  %v2519_v0 = vld [vmem:[%s4438_s4 + $0xf0] sm:$0xff] }
 0x263   : > { %2328 = vmatprep.subr.bf16.mxu1 %v3604_v7  ;;  %v2520_v7 = vld [vmem:[%s4438_s4 + $0xf8] sm:$0xff] }
 0x266   : > { %2329 = vmatpush1.bf16.msra.mxu1 %v3602_v17  ;;  %v3233_v17 = vpack.c.bf16 %v2502_v63, %v2501_v62 }
 0x267   : > { %2330 = vmatprep.subr.bf16.mxu1 %v3607_v56  ;;  %v3235_v56 = vpack.c.bf16 %v2520_v7, %v2519_v0 }
 0x26a   : > { %2331 = vmatpush1.bf16.msra.mxu1 %v3605_v53  ;;  %v2902_v53 = vld [vmem:[%s4437_s3 + $0x2] ss:$4 sm:$0x3] }
 0x26b   : > { %2332 = vmatprep.subr.bf16.mxu1 %v3610_v1  ;;  %v2383_v1 = vrot.slane %v2902_v53, %v4103_v36 }
 0x26e   : > { %2333 = vmatpush1.bf16.msra.mxu1 %v3608_v2  ;;  %v2903_v2 = vld [vmem:[%s4437_s3 + $0x3] ss:$4 sm:$0x3] }
 0x26f   : > { %2334 = vmatprep.subr.bf16.mxu1 %v3613_v3  ;;  %v2379_v3 = vrot.slane %v2902_v53, %v4097_v34 }
 0x272   : > { %2335 = vmatpush1.bf16.msra.mxu1 %v3611_v6 }
 0x273   : > { %2336 = vmatprep.subr.bf16.mxu1 %v3616_v8 }
 0x276   : > { %2337 = vmatpush1.bf16.msra.mxu1 %v3614_v14 }
 0x277   : > { %2338 = vmatprep.subr.bf16.mxu1 %v3619_v18  ;;  %v2402_v18 = vrot.slane %v2903_v2, %v4103_v36 }
 0x27a   : > { %2339 = vmatpush1.bf16.msra.mxu1 %v3617_v16 }
 0x27b   : > { %2340 = vmatprep.subr.bf16.mxu1 %v3622_v54 }
 0x27e   : > { %2341 = vmatpush1.bf16.msra.mxu1 %v3620_v22  ;;  %v2398_v22 = vrot.slane %v2903_v2, %v4097_v34 }
 0x27f   : > { %2342 = vmatprep.subr.bf16.mxu1 %v3625_v30 }
 0x282   : > { %2343 = vmatpush1.bf16.msra.mxu1 %v3623_v9 }
 0x283   : > { %2344 = vmatprep.subr.bf16.mxu1 %v3628_v19 }
 0x286   : > { %2345 = vmatpush1.bf16.msra.mxu1 %v3626_v20 }
 0x289   : > { %2347 = vmatmul.mubr.bf16.vlgmr.msra.gmra.mrb[0].mxu1 %v3100_v52  ;;  %v3207_v52 = vpack.c.bf16 %v2506_v45, %v2505_v24 }
 0x28a   : > { %2356 = vmatprep.mubr.bf16.mxu1 %v3103_v15  ;;  %v2508_v15 = vld [vmem:[%s4438_s4 + $0x98] sm:$0xff] }
 0x28b   : > { %v3211_v25 = vpack.c.bf16 %v2508_v15, %v2507_v12  ;;  %3208 = vmatprep.subr.bf16.mxu1 %v3207_v52 }
 0x291   : > { %2357 = vmatmul.mubr.bf16.gmra.mrb[4].mxu1 %v3102_v21  ;;  %v3209_v21 = vpack.c.bf16 %v2490_v10, %v2489_v46 }
 0x293   : > { %3210 = vmatpush3.bf16.msra.mxu1 %v3209_v21 }
 0x294   : > { %3212 = vmatprep.subr.bf16.mxu1 %v3211_v25 }
 0x297   : > { %3214 = vmatpush3.bf16.msra.mxu1 %v3213_v50 }
 0x298   : > { %3216 = vmatprep.subr.bf16.mxu1 %v3215_v29 }
 0x29b   : > { %3218 = vmatpush3.bf16.msra.mxu1 %v3217_v32  ;;  %v2413_v32 = vld [vmem:[%s4440_s6] sm:$0xf] }
 0x29c   : > { %3220 = vmatprep.subr.bf16.mxu1 %v3219_v35  ;;  %v2503_v35 = vld [vmem:[%s4438_s4 + $0x70] sm:$0xff] }
 0x29d   : > { %v3237_v38 = vpack.c.bf16 %v2504_v37, %v2503_v35  ;;  %v3641_v37 = vld [vmem:[%s3952_s17 + $0x30] sm:$0xff] }
 0x29f   : > { %3222 = vmatpush3.bf16.msra.mxu1 %v3221_v43  ;;  %v2592_v43 = vld [vmem:[%s4439_s5] sm:$0x3] }
 0x2a0   : > { %3224 = vmatprep.subr.bf16.mxu1 %v3223_v44 }
 0x2a3   : > { %3226 = vmatpush3.bf16.msra.mxu1 %v3225_v58 }
 0x2a4   : > { %3228 = vmatprep.subr.bf16.mxu1 %v3227_v59 }
 0x2a7   : > { %3230 = vmatpush3.bf16.msra.mxu1 %v3229_v55 }
 0x2a8   : > { %3232 = vmatprep.subr.bf16.mxu1 %v3231_v11 }
 0x2ab   : > { %3234 = vmatpush3.bf16.msra.mxu1 %v3233_v17 }
 0x2ac   : > { %3236 = vmatprep.subr.bf16.mxu1 %v3235_v56 }
 0x2af   : > { %3238 = vmatpush3.bf16.msra.mxu1 %v3237_v38 }
 0x35c   : > { %v2348_v6 = vpop.f32.mrb[0].mxu1 }
 0x35d   : > { %v2350_v8 = vpop.f32.mrb[1].mxu1  ;;  %v2386_v54 = vmul.f32 %v2379_v3, %v2348_v6 }
 0x35e   : > { %v2387_v14 = vmul.f32 %v2383_v1, %v2350_v8  ;;  %v2352_v16 = vpop.f32.mrb[2].mxu1 }
 0x35f   : > { %v2388_v30 = vmul.f32 %v2379_v3, %v2352_v16  ;;  %v2354_v9 = vpop.f32.mrb[3].mxu1  ;;  %v4321_v46 = vadd.f32 %v2398_v22, %v2386_v54 }
 0x360   : > { %v2389_v19 = vmul.f32 %v2383_v1, %v2354_v9  ;;  %v4317_v24 = vadd.f32 %v2402_v18, %v2387_v14 }
 0x361   : > { %v4315_v20 = vadd.f32 %v2398_v22, %v2388_v30 }
 0x362   : > { %v4319_v45 = vadd.f32 %v2402_v18, %v2389_v19 }
 0x363   : > { %v3201_v12 = vpack.c.bf16 %v4315_v20, %v4321_v46 }
 0x364   : > { %v2358_v52 = vpop.f32.mrb[4].mxu1  ;;  %v3199_v10 = vpack.c.bf16 %v4319_v45, %v4317_v24 }
 0x365   : > { %v2360_v15 = vpop.f32.mrb[5].mxu1  ;;  %v2390_v26 = vmul.f32 %v2379_v3, %v2358_v52 }
 0x366   : > { %v2391_v21 = vmul.f32 %v2383_v1, %v2360_v15  ;;  %v2362_v25 = vpop.f32.mrb[6].mxu1  ;;  %3200 = vmatprep.subr.bf16.mxu0 %v3199_v10 }
 0x367   : > { %v2392_v27 = vmul.f32 %v2379_v3, %v2362_v25  ;;  %v2364_v28 = vpop.f32.mrb[7].mxu1  ;;  %3202 = vmatpush1.bf16.msra.mxu0 %v3201_v12  ;;  %v4333_v31 = vadd.f32 %v2398_v22, %v2390_v26  ;;  %v3635_v26 = vld [vmem:[%s3952_s17] sm:$0xff] }
 0x368   : > { %v2393_v42 = vmul.f32 %v2383_v1, %v2364_v28  ;;  %v4329_v29 = vadd.f32 %v2402_v18, %v2391_v21 }
 0x369   : > { %v4327_v50 = vadd.f32 %v2398_v22, %v2392_v27  ;;  %v3636_v27 = vld [vmem:[%s3952_s17 + $0x8] sm:$0xff] }
 0x36a   : > { %v4331_v47 = vadd.f32 %v2402_v18, %v2393_v42  ;;  %v3638_v42 = vld [vmem:[%s3952_s17 + $0x18] sm:$0xff] }
 0x36b   : > { %v3205_v5 = vpack.c.bf16 %v4327_v50, %v4333_v31 }
 0x36c   : > { %v3203_v4 = vpack.c.bf16 %v4331_v47, %v4329_v29 }
 0x36e   : > { %3204 = vmatprep.subr.bf16.mxu0 %v3203_v4  ;;  %v3640_v4 = vld [vmem:[%s3952_s17 + $0x28] sm:$0xff] }
 0x36f   : > { %3206 = vmatpush1.bf16.msra.mxu0 %v3205_v5 }
 0x370   : > { %3194 = vmatprep.subr.mxu0 %v3775_v23 }
 0x372   : > { %3136 = vmatmul.mubr.msk.f32.vlgmr.msra.gmra.mrb[8].mxu0 %vm2414_vm7, %v2413_v32 }
 0x373   : > { %3195 = vmatpush3.msk.msra.mxu0 %vm2597_vm8, %v2592_v43  ;;  %3196 = vmatprep.mubr.msk.f32.mxu0 %vm3776_vm9, %v3775_v23  ;;  %v3780_v23 = vmov 1966171168  }
 0x374   : > { %v2695_v40 = vunpack.c.l.s4 %v3780_v23 }
 0x376   : > { %v2696_v11 = vunpack.c.0.s8 %v2695_v40 }
 0x378   : > { %v2699_v7 = vsub.s32 %v2696_v11, %v4094_v33 }
 0x445   : > { %v2484_v39 = vpop.f32.mrb[8].mxu0 }
 0x446   : > { %v2486_v41 = vpop.f32.mrb[9].mxu0 }
 0x447   : > { %2585 = vmatprep.mubr.f32.mxu1 %v2486_v41 }
 0x448   : > { %2586 = vmatmul.mubr.f32.vlgmr.msra.gmra.mrb[8].mxu1 %v2484_v39  ;;  %v3642_v39 = vld [vmem:[%s3952_s17 + $0x38] sm:$0xff] }
 0x51b   : > { %v3189_v44 = vpop.f32.mrb[8].mxu1 }
 0x51c   : > { %v3190_v48 = vpop.f32.mrb[9].mxu1 }
 0x51d   : > { %v3191_v49 = vadd.f32 %v3190_v48, %v3189_v44 }
 0x51f   : > { %v2591_v13 = vmax.f32 %v3191_v49, 0.0 }
 0x521   : > { %3197 = vmatmul.mubr.msk.f32.vlgmr.msra.gmra.mrb[10].mxu0 %vm2593_vm10, %v2591_v13 }
 0x5f4   : > { %v2667_v57 = vpop.f32.mrb[10].mxu0 }
 0x5f5   : > { %v3139_v58 = vmul.f32 -1.442695, %v2667_v57  ;;  %v3198_v59 = vpop.f32.mrb[11].mxu0 }
 0x5f7   : > { %3629 = vpow2.f32 %v3139_v58 }
 0x601   : > { %v3630_v60 = vpop.eup %3629 }
 0x602   : > { %v2674_v61 = vadd.f32 1.0, %v3630_v60 }
 0x604   : > { %3631 = vrcp.f32 %v2674_v61 }
 0x60e   : > { %v3632_v51 = vpop.eup %3631 }
 0x60f   : > { %2678 = vrot.lane.b32.xlu0 %v3632_v51, %s3777_s9  ;;  %2684 = vrot.lane.b32.xlu1 %v3632_v51, %s3778_s15 }
 0x613   : > { %2681 = vrot.lane.b32.xlu0 %v3632_v51, %s3779_s10 }
 0x681   : > { %v2679_v55 = vpop.permute.xlu0 %2678  ;;  %v2685_v0 = vpop.permute.xlu1 %2684 }
 0x682   : > { %v2687_v62 = vsel %vm2414_vm7, %v3632_v51, %v2679_v55 }
 0x685   : > { %v2682_v63 = vpop.permute.xlu0 %2681 }
 0x686   : > { %v2689_v17 = vsel %vm2688_vm11, %v2687_v62, %v2682_v63 }
 0x687   : > { %v2691_v56 = vsel %vm2690_vm12, %v2689_v17, %v2685_v0 }
 0x688   : > { %v2693_v53 = vcombine.low %v2691_v56, %v2691_v56 }
 0x68a   : > { %v2700_v1 = vrot.slane %v2693_v53, %v2699_v7 }
 0x68c   : > { %v2701_v2 = vcombine.high %v2700_v1, %v2700_v1  ;;  %v2708_v3 = vrot.slane %v2700_v1, %v2699_v7 }
 0x68e   : > { %v2715_v6 = vrot.slane %v2701_v2, %v2699_v7  ;;  %v2716_v8 = vcombine.high %v2708_v3, %v2708_v3  ;;  %v2721_v14 = vrot.slane %v2708_v3, %v4097_v34  ;;  %v2725_v18 = vrot.slane %v2708_v3, %v4103_v36 }
 0x690   : > { %v2717_v16 = vcombine.high %v2715_v6, %v2715_v6  ;;  %v2729_v33 = vrot.slane %v2715_v6, %v4097_v34  ;;  %v2733_v54 = vrot.slane %v2715_v6, %v4103_v36  ;;  %v2737_v22 = vrot.slane %v2716_v8, %v4097_v34 }
 0x691   : > { %v2741_v30 = vrot.slane %v2716_v8, %v4103_v36  ;;  %v2758_v9 = vmul.f32 %v2721_v14, %v4321_v46  ;;  %v2759_v19 = vmul.f32 %v2725_v18, %v4317_v24 }
 0x692   : > { %v2745_v52 = vrot.slane %v2717_v16, %v4097_v34  ;;  %v2749_v10 = vrot.slane %v2717_v16, %v4103_v36  ;;  %v2760_v12 = vmul.f32 %v2729_v33, %v4315_v20  ;;  %v2761_v15 = vmul.f32 %v2733_v54, %v4319_v45  ;;  %v3637_v36 = vld [vmem:[%s3952_s17 + $0x10] sm:$0xff] }
 0x693   : > { %v2762_v21 = vmul.f32 %v2737_v22, %v4333_v31  ;;  %v2763_v25 = vmul.f32 %v2741_v30, %v4329_v29  ;;  %v2766_v46 = vadd.f32 %v3635_v26, %v2758_v9  ;;  %v2767_v28 = vadd.f32 %v3636_v27, %v2759_v19  ;;  %v3639_v31 = vld [vmem:[%s3952_s17 + $0x20] sm:$0xff]  ;;  %s4393_s17 = scalar_lea.sflag [#allocation5], %s302_s19 }
 0x694   : > { %v2764_v34 = vmul.f32 %v2745_v52, %v4327_v50  ;;  %v2765_v24 = vmul.f32 %v2749_v10, %v4331_v47  ;;  %v2768_v20 = vadd.f32 %v3637_v36, %v2760_v12  ;;  %v2769_v45 = vadd.f32 %v3638_v42, %v2761_v15 }
 0x695   : > { %v2770_v29 = vadd.f32 %v3639_v31, %v2762_v21  ;;  %v2771_v5 = vadd.f32 %v3640_v4, %v2763_v25  ;;  %v2774_v32 = vmax.f32 %v2766_v46, 0.0  ;;  %v2775_v35 = vmax.f32 %v2767_v28, 0.0 }
 0x696   : > { %v2772_v38 = vadd.f32 %v3641_v37, %v2764_v34  ;;  %v2773_v50 = vadd.f32 %v3642_v39, %v2765_v24  ;;  %v2776_v41 = vmax.f32 %v2768_v20, 0.0  ;;  %v2777_v47 = vmax.f32 %v2769_v45, 0.0 }
 0x697   : > { %v2778_v43 = vmax.f32 %v2770_v29, 0.0  ;;  %v2779_v44 = vmax.f32 %v2771_v5, 0.0  ;;  %2782 = vst [vmem:[%s304_s18] sm:$0xff] %v2774_v32  ;;  %2783 = vst [vmem:[%s304_s18 + $0x8] sm:$0xff] %v2775_v35 }
 0x698   : > { %v2780_v48 = vmax.f32 %v2772_v38, 0.0  ;;  %v2781_v49 = vmax.f32 %v2773_v50, 0.0  ;;  %2784 = vst [vmem:[%s304_s18 + $0x10] sm:$0xff] %v2776_v41  ;;  %2785 = vst [vmem:[%s304_s18 + $0x18] sm:$0xff] %v2777_v47 }
 0x699   : > { %2786 = vst [vmem:[%s304_s18 + $0x20] sm:$0xff] %v2778_v43  ;;  %2787 = vst [vmem:[%s304_s18 + $0x28] sm:$0xff] %v2779_v44 }
 0x69a   : > { %2788 = vst [vmem:[%s304_s18 + $0x30] sm:$0xff] %v2780_v48  ;;  %2789 = vst [vmem:[%s304_s18 + $0x38] sm:$0xff] %v2781_v49 }
 0x69b   : > { %3712 = shalt.err (!%p3709_p11)
}
 0x69c   : > { %s3713_s9 = scalar_lea.hbm %s4387_s21, 1024  ;;  %s3717_s19 = scalar_lea.hbm %s4441_s7, 2048 }
 0x69d   : > { %p3714_p13 = scmp.ne.s32.totalorder %s4387_s21, %s3713_s9  ;;  %p3718_p6 = scmp.lt.u32.totalorder %s4387_s21, %s4441_s7 }
 0x69e   : > { %p3719_p9 = scmp.lt.u32.totalorder %s3717_s19, %s3713_s9  ;;  %p3721_p10 = scmp.lt.u32.totalorder %s3713_s9, %s4387_s21 }
 0x69f   : > { %p3715_p5 = pnand %p3714_p13, %p4465_p1 }
 0x6a0   : > { %p3720_p12 = por %p3719_p9, %p3718_p6 }
 0x6a1   : > { %p3716_p0 = pneg %p3715_p5 }
 0x6a2   : > { %p3722_p2 = por %p3721_p10, %p3720_p12 }
 0x6a4   : > { %p3723_p3 = pnand %p3722_p2, %p3716_p0 }
 0x6a6   : > { %3726 = shalt.err (!%p3723_p3)
}
 0x6a7   : > { %s3782_s18 = smov 256   ;;  %s3783_s28 = smov 16  }
 0x6a8   : > { %3279 = dma.vmem_to_hbm [thread:$0]  (%p4465_p1), %s4389_s14, 1024, %s4387_s21, %s4393_s17, %s3782_s18, %s3782_s18, %s3783_s28  }
 0x6a9 PF: > { %p3296_p4 = scmp.ge.s32.totalorder %s3769_s27, 2  ;;  %s2820_s20 = sand.u32 1, %s3757_s24  }
 0x6aa   : > { %p4466_p7 = scmp.ne.s32.totalorder %s4447_s12, 0  ;;  %s2821_s22 = scalar_lea.sflag [#allocation5], %s2820_s20 }
 0x6ac   : > { %p3289_p8 = pnand %p3296_p4, %p4466_p7 }
 0x6ae   : > { %3752 = dma.done.wait (!%p3289_p8), %s2821_s22, 1024  }
 0x6af   : > { %3754 = vsyncadd (!%p3289_p8), %s2821_s22, 4294966272  ;;  %s4467_s23 = sld [smem:[#allocation12_spill]]  ;;  %p19_p11 = scmp.ge.s32.totalorder %s3849_s30, 4  }
 0x6b0   : > { %s4468_s24 = smov %s3761_s25  ;;  %s4469_s25 = smov %s3765_s26 }
 0x6b1   : > { %s4471_s27 = smov %s3849_s30  ;;  %21 = sbr.rel (!%p19_p11) target bundleno = 5 (0x5), region = 99 }
 0x6b5   : > { %s4470_s26 = smov %s4467_s23 }
 0x6b8   :  { %2826 = vsyncpa [#allocation4], 1 }
 0x6b9   :  { %2828 = vsyncpa [#allocation4 + $0x1], 1 }
 0x6ba   :  { %2829 = vsyncpa [#allocation7], 1 }
 0x6bb   :  { %2830 = vsyncpa [#allocation5], 1 }
 0x6bc   :  { %2832 = vsyncpa [#allocation5 + $0x1], 1 }

</bundles_post_ra>
